<compile_context>
chip_gen: v6e
topology: v6e:2x2x1
jax: 0.10.0
libtpu: 0.0.40
codegen_flags: <defaults>
</compile_context>

<pallas_src>
import functools
import math

import jax
import jax.numpy as jnp
from jax import lax
from jax.experimental import pallas as pl
from jax.experimental.pallas import tpu as pltpu


# ----------------------------- in-kernel helpers -----------------------------

def _layer_norm(x, gamma, beta, eps=1e-12):
    # BertLayerNorm: biased variance, eps=1e-12
    mu = jnp.mean(x, axis=-1, keepdims=True)
    var = jnp.mean(jnp.square(x - mu), axis=-1, keepdims=True)
    return (x - mu) * lax.rsqrt(var + eps) * gamma + beta


def _gelu(x):
    # TODO(synk): HF Bert uses exact erf-GELU; tanh approximation used here.
    return jax.nn.gelu(x, approximate=True)


# ---------------------- kernel A: input linear + LSTM ------------------------

def lstm_kernel(
    x_ref, win_ref, bin_ref, wih_ref, whh_ref, blstm_ref,   # inputs
    out_ref,                                                # output
    xbuf, gbuf,                                             # scratch
    *, seq_len, batch_tile, hidden, n_layers,
):
    f32 = jnp.float32
    S, Bt, D = seq_len, batch_tile, hidden

    # input linear on all S*Bt time-major rows at once: (S*Bt, F) @ (F, D)
    x = x_ref[0]
    xbuf[...] = jnp.dot(x, win_ref[...], preferred_element_type=f32) + bin_ref[...]

    # LSTM (batch_first, zero init state); packed gate order matches torch
    # nn.LSTM: columns [i | f | g | o], bias = b_ih + b_hh.
    for layer in range(n_layers):
        xl = xbuf[...]                                       # (S*Bt, D)
        # one packed input-gate matmul for the whole tile
        gbuf[...] = (jnp.dot(xl, wih_ref[layer], preferred_element_type=f32)
                     + blstm_ref[layer])                     # (S*Bt, 4D)

        def step(t, carry, layer=layer):
            h_prev, c_prev = carry                           # (Bt, D) registers
            # single packed recurrent matmul per timestep
            g = (gbuf[pl.ds(t * Bt, Bt), :]
                 + jnp.dot(h_prev, whh_ref[layer], preferred_element_type=f32))
            i_g = jax.nn.sigmoid(g[:, 0:D])
            f_g = jax.nn.sigmoid(g[:, D:2 * D])
            g_g = jnp.tanh(g[:, 2 * D:3 * D])
            o_g = jax.nn.sigmoid(g[:, 3 * D:4 * D])
            c_t = f_g * c_prev + i_g * g_g
            h_t = o_g * jnp.tanh(c_t)
            xbuf[pl.ds(t * Bt, Bt), :] = h_t                 # running h sequence
            return h_t, c_t

        h0 = jnp.zeros((Bt, D), f32)
        c0 = jnp.zeros((Bt, D), f32)
        lax.fori_loop(0, S, step, (h0, c0),
                      unroll=True if S <= 32 else 8)

    out_ref[0] = xbuf[...]                                   # (S*Bt, D)


# --------------- kernel B: BERT encoder layer + MLP head (per example) -------

def attn_head_kernel(
    mask_ref, hs_ref,
    wqkv_ref, bqkv_ref, wo_ref, bo_ref, ln1g_ref, ln1b_ref,
    wi_ref, bi_ref, wo2_ref, bo2_ref, ln2g_ref, ln2b_ref,
    w1_ref, b1_ref, w2_ref, b2_ref,
    out_ref,
    ctx_buf,
    *, seq_len, hidden, n_heads, head_dim,
):
    f32 = jnp.float32
    S, D = seq_len, hidden

    hs = hs_ref[0]                                           # (S, D)

    # additive attention mask; broadcast hoisted out of the head loop
    ext = (1.0 - mask_ref[...]) * (-10000.0)                 # (1, S)
    ext_b = jnp.broadcast_to(ext, (S, S))
    scale = 1.0 / math.sqrt(head_dim)

    # single packed QKV projection: (S, D) @ (D, 3D)
    qkv = jnp.dot(hs, wqkv_ref[...], preferred_element_type=f32) + bqkv_ref[...]
    q = qkv[:, 0:D]
    k = qkv[:, D:2 * D]
    v = qkv[:, 2 * D:3 * D]

    for h in range(n_heads):
        lo, hi = h * head_dim, (h + 1) * head_dim
        q_h, k_h, v_h = q[:, lo:hi], k[:, lo:hi], v[:, lo:hi]
        s = lax.dot_general(q_h, k_h, (((1,), (1,)), ((), ())),
                            preferred_element_type=f32) * scale      # (S, S)
        s = s + ext_b
        s = s - jnp.max(s, axis=-1, keepdims=True)
        p = jnp.exp(s)
        p = p * pl.reciprocal(jnp.sum(p, axis=-1, keepdims=True), approx=True)
        # head context lands in its lane range -> one packed Wo matmul below
        ctx_buf[:, lo:hi] = jnp.dot(p, v_h, preferred_element_type=f32)

    attn_out = (jnp.dot(ctx_buf[...], wo_ref[...], preferred_element_type=f32)
                + bo_ref[...])
    attn_ln = _layer_norm(attn_out + hs, ln1g_ref[...], ln1b_ref[...])
    inter = _gelu(jnp.dot(attn_ln, wi_ref[...], preferred_element_type=f32)
                  + bi_ref[...])
    ffn = jnp.dot(inter, wo2_ref[...], preferred_element_type=f32) + bo2_ref[...]
    seq_out = _layer_norm(ffn + attn_ln, ln2g_ref[...], ln2b_ref[...])

    # output MLP: D -> dense (ReLU) -> 1, written as a lane-dense (1, S) row
    m1 = jax.nn.relu(jnp.dot(seq_out, w1_ref[...], preferred_element_type=f32)
                     + b1_ref[...])                                   # (S, dense)
    y = (lax.dot_general(w2_ref[...], m1, (((1,), (1,)), ((), ())),
                         preferred_element_type=f32) + b2_ref[...])   # (1, S)
    out_ref[0] = y


# --------------------------------- wrapper -----------------------------------

def _rep_spec(shape):
    """BlockSpec for a weight: same full block at every grid step."""
    r = len(shape)
    return pl.BlockSpec(shape, lambda b, r=r: (0,) * r)


def lstm_attention_forward(x, params, cfg):
    """Glue: embedding gathers + two pallas_calls (LSTM stage, attention stage)."""
    # embedding lookups (plain-JAX gather, equivalent to EmbedLayer + cat)
    emb = [params["emb"][name][x[name]] for name in cfg["label_len_dict"]]
    feat = jnp.concatenate(
        emb + [x[c][..., None].astype(jnp.float32) for c in cfg["non_embed_cols"]],
        axis=-1)                                                      # (B, S, F)
    mask = x["mask"].astype(jnp.float32)                              # (B, S)

    B, S, F = feat.shape
    D = cfg["output_dim"]
    L = cfg["n_layers"]
    nh = cfg["n_heads"]
    hd = D // nh

    # ---------------- stage 1: input linear + multi-layer LSTM ----------------
    # batch tile = largest divisor of B <= 16 (puts B on the matmul M dim so the
    # serial timestep loop runs S times per shard, not B*S times total).
    Bt = 1
    for cand in range(min(B, 16), 0, -1):
        if B % cand == 0:
            Bt = cand
            break
    nshard = B // Bt

    # time-major flat rows (row = t*Bt + b): the recurrence reads/writes a
    # contiguous (Bt, 4D)/(Bt, D) slab per timestep.
    feat_tm = (feat.reshape(nshard, Bt, S, F)
               .transpose(0, 2, 1, 3)
               .reshape(nshard, S * Bt, F))

    lstm_fn = functools.partial(
        lstm_kernel, seq_len=S, batch_tile=Bt, hidden=D, n_layers=L)

    lstm_weights = (params["W_in"], params["b_in"],
                    params["W_ih"], params["W_hh"], params["b_lstm"])

    lstm_out = pl.pallas_call(
        lstm_fn,
        out_shape=jax.ShapeDtypeStruct((nshard, S * Bt, D), jnp.float32),
        grid_spec=pltpu.PrefetchScalarGridSpec(
            num_scalar_prefetch=0,
            grid=(nshard,),
            in_specs=[pl.BlockSpec((1, S * Bt, F), lambda n: (n, 0, 0))]
                     + [_rep_spec(w.shape) for w in lstm_weights],
            out_specs=pl.BlockSpec((1, S * Bt, D), lambda n: (n, 0, 0)),
            scratch_shapes=[
                pltpu.VMEM((S * Bt, D), jnp.float32),       # running h sequence
                pltpu.VMEM((S * Bt, 4 * D), jnp.float32),   # packed input gates
            ],
        ),
        compiler_params=pltpu.CompilerParams(
            dimension_semantics=("parallel",)),
    )(feat_tm, *lstm_weights)

    # back to batch-major (B, S, D) for the attention stage (plain-JAX relayout)
    hs = (lstm_out.reshape(nshard, S, Bt, D)
          .transpose(0, 2, 1, 3)
          .reshape(B, S, D))

    # ------------- stage 2: BERT encoder + MLP head, one example / step -------
    attn_fn = functools.partial(
        attn_head_kernel, seq_len=S, hidden=D, n_heads=nh, head_dim=hd)

    attn_weights = (params["Wqkv"], params["bqkv"],
                    params["Wo"], params["bo"], params["ln1_g"], params["ln1_b"],
                    params["Wi"], params["bi"], params["Wo2"], params["bo2"],
                    params["ln2_g"], params["ln2_b"],
                    params["W1"], params["b1"], params["W2"], params["b2"])

    out = pl.pallas_call(
        attn_fn,
        out_shape=jax.ShapeDtypeStruct((B, 1, S), jnp.float32),
        grid_spec=pltpu.PrefetchScalarGridSpec(
            num_scalar_prefetch=0,
            grid=(B,),
            in_specs=[pl.BlockSpec((1, S), lambda b: (b, 0)),
                      pl.BlockSpec((1, S, D), lambda b: (b, 0, 0))]
                     + [_rep_spec(w.shape) for w in attn_weights],
            out_specs=pl.BlockSpec((1, 1, S), lambda b: (b, 0, 0)),
            scratch_shapes=[pltpu.VMEM((S, D), jnp.float32)],   # packed ctx heads
        ),
        compiler_params=pltpu.CompilerParams(
            dimension_semantics=("parallel",)),
    )(mask, hs, *attn_weights)

    return out.reshape(B, S)                                          # y_hat.view(B, -1)


# ----------------------------- parameter init --------------------------------

def init_params(key, cfg):
    keys = iter(jax.random.split(key, 48))

    def nrm(shape, scale=0.1):
        return scale * jax.random.normal(next(keys), shape, dtype=jnp.float32)

    E = cfg["embedding_dim"]
    D = cfg["output_dim"]          # == input_dim (so stacked LSTM weights are uniform)
    L = cfg["n_layers"]
    dense = cfg["dense_layer_dim"]
    F = E * len(cfg["label_len_dict"]) + len(cfg["non_embed_cols"])

    p = {}
    p["emb"] = {name: nrm((n, E), 1.0) for name, n in cfg["label_len_dict"].items()}
    p["W_in"] = nrm((F, cfg["input_dim"]))
    p["b_in"] = nrm((1, cfg["input_dim"]), 0.02)
    # packed LSTM weights: columns are [i | f | g | o] (torch gate order);
    # torch has separate b_ih / b_hh which are only ever summed.
    p["W_ih"] = nrm((L, D, 4 * D))
    p["W_hh"] = nrm((L, D, 4 * D))
    p["b_lstm"] = nrm((L, 1, 4 * D), 0.02) + nrm((L, 1, 4 * D), 0.02)
    # packed QKV projection: columns [Q | K | V], head-major inside each block
    p["Wqkv"] = nrm((D, 3 * D)); p["bqkv"] = nrm((1, 3 * D), 0.02)
    p["Wo"] = nrm((D, D)); p["bo"] = nrm((1, D), 0.02)
    p["ln1_g"] = jnp.ones((1, D), jnp.float32)
    p["ln1_b"] = jnp.zeros((1, D), jnp.float32)
    p["Wi"] = nrm((D, D)); p["bi"] = nrm((1, D), 0.02)      # intermediate_size == D
    p["Wo2"] = nrm((D, D)); p["bo2"] = nrm((1, D), 0.02)
    p["ln2_g"] = jnp.ones((1, D), jnp.float32)
    p["ln2_b"] = jnp.zeros((1, D), jnp.float32)
    p["W1"] = nrm((D, dense)); p["b1"] = nrm((1, dense), 0.02)
    p["W2"] = nrm((1, dense)); p["b2"] = nrm((1, 1), 0.02)  # W2 stored as a row
    return p


# ----------------------------------- main -------------------------------------

if __name__ == "__main__":
    cfg = {
        "embedding_dim": 8,
        "input_dim": 32,
        "output_dim": 32,
        "n_layers": 2,
        "n_heads": 4,
        "dense_layer_dim": 64,
        "drop_out": 0.0,
        "label_len_dict": {"interaction": 3, "question": 10, "tag": 8},
        "non_embed_cols": ["elapsed"],
    }
    B, S = 2, 8

    key = jax.random.PRNGKey(0)
    kx, kp = jax.random.split(key)
    ks = jax.random.split(kx, 5)
    x = {
        "interaction": jax.random.randint(ks[0], (B, S), 0, cfg["label_len_dict"]["interaction"]),
        "question": jax.random.randint(ks[1], (B, S), 0, cfg["label_len_dict"]["question"]),
        "tag": jax.random.randint(ks[2], (B, S), 0, cfg["label_len_dict"]["tag"]),
        "elapsed": jax.random.uniform(ks[3], (B, S), jnp.float32),
        "mask": (jax.random.uniform(ks[4], (B, S)) > 0.2).astype(jnp.float32),
    }

    params = init_params(kp, cfg)
    y_hat = lstm_attention_forward(x, params, cfg)
    y_hat = jax.block_until_ready(y_hat)

    assert y_hat.shape == (B, S), y_hat.shape
    assert bool(jnp.all(jnp.isfinite(y_hat)))
    print("KERNEL_OK")
</pallas_src>

<mosaic_0001>
module attributes {stable_mosaic.version = 11 : i64} {
  func.func @lstm_kernel(%arg0: i32, %arg1: memref<1x16x25xf32, #tpu.memory_space<vmem>>, %arg2: memref<25x32xf32, #tpu.memory_space<vmem>>, %arg3: memref<1x32xf32, #tpu.memory_space<vmem>>, %arg4: memref<2x32x128xf32, #tpu.memory_space<vmem>>, %arg5: memref<2x32x128xf32, #tpu.memory_space<vmem>>, %arg6: memref<2x1x128xf32, #tpu.memory_space<vmem>>, %arg7: memref<1x16x32xf32, #tpu.memory_space<vmem>>, %arg8: memref<16x32xf32, #tpu.memory_space<vmem>>, %arg9: memref<16x128xf32, #tpu.memory_space<vmem>>) attributes {dimension_semantics = [#tpu.dimension_semantics<parallel>], iteration_bounds = array<i64: 1>, scalar_prefetch = 0 : i64, scratch_operands = 2 : i64, tpu.core_type = #tpu.core_type<tc>, window_params = [{transform_indices = @transform_0, window_bounds = array<i64: 1, 16, 25>}, {pipeline_mode = #tpu.pipeline_mode<synchronous>, transform_indices = @transform_1, window_bounds = array<i64: 25, 32>}, {pipeline_mode = #tpu.pipeline_mode<synchronous>, transform_indices = @transform_2, window_bounds = array<i64: 1, 32>}, {pipeline_mode = #tpu.pipeline_mode<synchronous>, transform_indices = @transform_3, window_bounds = array<i64: 2, 32, 128>}, {pipeline_mode = #tpu.pipeline_mode<synchronous>, transform_indices = @transform_4, window_bounds = array<i64: 2, 32, 128>}, {pipeline_mode = #tpu.pipeline_mode<synchronous>, transform_indices = @transform_5, window_bounds = array<i64: 2, 1, 128>}, {transform_indices = @transform_6, window_bounds = array<i64: 1, 16, 32>}]} {
    %c0 = arith.constant 0 : index
    %c0_0 = arith.constant 0 : index
    %c0_1 = arith.constant 0 : index
    %0 = vector.load %arg1[%c0, %c0_0, %c0_1] : memref<1x16x25xf32, #tpu.memory_space<vmem>>, vector<1x16x25xf32>
    %1 = vector.shape_cast %0 : vector<1x16x25xf32> to vector<16x25xf32>
    %c0_2 = arith.constant 0 : index
    %c0_3 = arith.constant 0 : index
    %2 = vector.load %arg2[%c0_2, %c0_3] : memref<25x32xf32, #tpu.memory_space<vmem>>, vector<25x32xf32>
    %cst = arith.constant dense<0.000000e+00> : vector<16x32xf32>
    %3 = tpu.matmul %1, %2, %cst {dimension_numbers = #tpu.dot_dimension_numbers<[1], [0], [0], [1], [0, 0, 1, 1], [], []>} : vector<16x25xf32>, vector<25x32xf32>, vector<16x32xf32> -> vector<16x32xf32>
    %c0_4 = arith.constant 0 : index
    %c0_5 = arith.constant 0 : index
    %4 = vector.load %arg3[%c0_4, %c0_5] : memref<1x32xf32, #tpu.memory_space<vmem>>, vector<1x32xf32>
    %5 = vector.broadcast %4 : vector<1x32xf32> to vector<16x32xf32>
    %6 = arith.addf %3, %5 : vector<16x32xf32>
    %c0_6 = arith.constant 0 : index
    %c0_7 = arith.constant 0 : index
    %7 = vector.load %arg8[%c0_6, %c0_7] : memref<16x32xf32, #tpu.memory_space<vmem>>, vector<16x32xf32>
    tpu.vector_store %arg8[%c0_6, %c0_7], %6 {strides = array<i32>} : memref<16x32xf32, #tpu.memory_space<vmem>>, vector<16x32xf32>,
    %c0_8 = arith.constant 0 : index
    %c0_9 = arith.constant 0 : index
    %8 = vector.load %arg8[%c0_8, %c0_9] : memref<16x32xf32, #tpu.memory_space<vmem>>, vector<16x32xf32>
    %c0_10 = arith.constant 0 : index
    %c0_11 = arith.constant 0 : index
    %c0_12 = arith.constant 0 : index
    %9 = vector.load %arg4[%c0_10, %c0_11, %c0_12] : memref<2x32x128xf32, #tpu.memory_space<vmem>>, vector<1x32x128xf32>
    %10 = vector.shape_cast %9 : vector<1x32x128xf32> to vector<32x128xf32>
    %cst_13 = arith.constant dense<0.000000e+00> : vector<16x128xf32>
    %11 = tpu.matmul %8, %10, %cst_13 {dimension_numbers = #tpu.dot_dimension_numbers<[1], [0], [0], [1], [0, 0, 1, 1], [], []>} : vector<16x32xf32>, vector<32x128xf32>, vector<16x128xf32> -> vector<16x128xf32>
    %c0_14 = arith.constant 0 : index
    %c0_15 = arith.constant 0 : index
    %c0_16 = arith.constant 0 : index
    %12 = vector.load %arg6[%c0_14, %c0_15, %c0_16] : memref<2x1x128xf32, #tpu.memory_space<vmem>>, vector<1x1x128xf32>
    %13 = vector.shape_cast %12 : vector<1x1x128xf32> to vector<1x128xf32>
    %14 = vector.broadcast %13 : vector<1x128xf32> to vector<16x128xf32>
    %15 = arith.addf %11, %14 : vector<16x128xf32>
    %c0_17 = arith.constant 0 : index
    %c0_18 = arith.constant 0 : index
    %16 = vector.load %arg9[%c0_17, %c0_18] : memref<16x128xf32, #tpu.memory_space<vmem>>, vector<16x128xf32>
    tpu.vector_store %arg9[%c0_17, %c0_18], %15 {strides = array<i32>} : memref<16x128xf32, #tpu.memory_space<vmem>>, vector<16x128xf32>,
    %cst_19 = arith.constant 0.000000e+00 : f32
    %17 = vector.broadcast %cst_19 : f32 to vector<2x32xf32>
    %cst_20 = arith.constant 0.000000e+00 : f32
    %18 = vector.broadcast %cst_20 : f32 to vector<2x32xf32>
    %c0_i32 = arith.constant 0 : i32
    %c2_i32 = arith.constant 2 : i32
    %19 = arith.muli %c0_i32, %c2_i32 : i32
    %20 = arith.index_cast %19 : i32 to index
    %c0_21 = arith.constant 0 : index
    %21 = vector.load %arg9[%20, %c0_21] : memref<16x128xf32, #tpu.memory_space<vmem>>, vector<2x128xf32>
    %c0_22 = arith.constant 0 : index
    %c0_23 = arith.constant 0 : index
    %c0_24 = arith.constant 0 : index
    %22 = vector.load %arg5[%c0_22, %c0_23, %c0_24] : memref<2x32x128xf32, #tpu.memory_space<vmem>>, vector<1x32x128xf32>
    %23 = vector.shape_cast %22 : vector<1x32x128xf32> to vector<32x128xf32>
    %cst_25 = arith.constant dense<0.000000e+00> : vector<2x128xf32>
    %24 = tpu.matmul %17, %23, %cst_25 {dimension_numbers = #tpu.dot_dimension_numbers<[1], [0], [0], [1], [0, 0, 1, 1], [], []>} : vector<2x32xf32>, vector<32x128xf32>, vector<2x128xf32> -> vector<2x128xf32>
    %25 = arith.addf %21, %24 : vector<2x128xf32>
    %26 = vector.extract_strided_slice %25 {offsets = [0, 0], sizes = [2, 32], strides = [1, 1]} : vector<2x128xf32> to vector<2x32xf32>
    %27 = arith.negf %26 : vector<2x32xf32>
    %28 = math.exp %27 : vector<2x32xf32>
    %cst_26 = arith.constant 1.000000e+00 : f32
    %29 = vector.broadcast %cst_26 : f32 to vector<2x32xf32>
    %30 = arith.addf %29, %28 : vector<2x32xf32>
    %31 = arith.divf %29, %30 : vector<2x32xf32>
    %32 = vector.extract_strided_slice %25 {offsets = [0, 32], sizes = [2, 32], strides = [1, 1]} : vector<2x128xf32> to vector<2x32xf32>
    %33 = arith.negf %32 : vector<2x32xf32>
    %34 = math.exp %33 : vector<2x32xf32>
    %cst_27 = arith.constant 1.000000e+00 : f32
    %35 = vector.broadcast %cst_27 : f32 to vector<2x32xf32>
    %36 = arith.addf %35, %34 : vector<2x32xf32>
    %37 = arith.divf %35, %36 : vector<2x32xf32>
    %38 = vector.extract_strided_slice %25 {offsets = [0, 64], sizes = [2, 32], strides = [1, 1]} : vector<2x128xf32> to vector<2x32xf32>
    %39 = math.tanh %38 : vector<2x32xf32>
    %40 = vector.extract_strided_slice %25 {offsets = [0, 96], sizes = [2, 32], strides = [1, 1]} : vector<2x128xf32> to vector<2x32xf32>
    %41 = arith.negf %40 : vector<2x32xf32>
    %42 = math.exp %41 : vector<2x32xf32>
    %cst_28 = arith.constant 1.000000e+00 : f32
    %43 = vector.broadcast %cst_28 : f32 to vector<2x32xf32>
    %44 = arith.addf %43, %42 : vector<2x32xf32>
    %45 = arith.divf %43, %44 : vector<2x32xf32>
    %46 = arith.mulf %37, %18 : vector<2x32xf32>
    %47 = arith.mulf %31, %39 : vector<2x32xf32>
    %48 = arith.addf %46, %47 : vector<2x32xf32>
    %49 = math.tanh %48 : vector<2x32xf32>
    %50 = arith.mulf %45, %49 : vector<2x32xf32>
    %c2_i32_29 = arith.constant 2 : i32
    %51 = arith.muli %c0_i32, %c2_i32_29 : i32
    %52 = arith.index_cast %51 : i32 to index
    %c0_30 = arith.constant 0 : index
    %53 = vector.load %arg8[%52, %c0_30] : memref<16x32xf32, #tpu.memory_space<vmem>>, vector<2x32xf32>
    tpu.vector_store %arg8[%52, %c0_30], %50 {strides = array<i32>} : memref<16x32xf32, #tpu.memory_space<vmem>>, vector<2x32xf32>,
    %c1_i32 = arith.constant 1 : i32
    %c2_i32_31 = arith.constant 2 : i32
    %54 = arith.muli %c1_i32, %c2_i32_31 : i32
    %55 = arith.index_cast %54 : i32 to index
    %c0_32 = arith.constant 0 : index
    %56 = vector.load %arg9[%55, %c0_32] : memref<16x128xf32, #tpu.memory_space<vmem>>, vector<2x128xf32>
    %c0_33 = arith.constant 0 : index
    %c0_34 = arith.constant 0 : index
    %c0_35 = arith.constant 0 : index
    %57 = vector.load %arg5[%c0_33, %c0_34, %c0_35] : memref<2x32x128xf32, #tpu.memory_space<vmem>>, vector<1x32x128xf32>
    %58 = vector.shape_cast %57 : vector<1x32x128xf32> to vector<32x128xf32>
    %cst_36 = arith.constant dense<0.000000e+00> : vector<2x128xf32>
    %59 = tpu.matmul %50, %58, %cst_36 {dimension_numbers = #tpu.dot_dimension_numbers<[1], [0], [0], [1], [0, 0, 1, 1], [], []>} : vector<2x32xf32>, vector<32x128xf32>, vector<2x128xf32> -> vector<2x128xf32>
    %60 = arith.addf %56, %59 : vector<2x128xf32>
    %61 = vector.extract_strided_slice %60 {offsets = [0, 0], sizes = [2, 32], strides = [1, 1]} : vector<2x128xf32> to vector<2x32xf32>
    %62 = arith.negf %61 : vector<2x32xf32>
    %63 = math.exp %62 : vector<2x32xf32>
    %cst_37 = arith.constant 1.000000e+00 : f32
    %64 = vector.broadcast %cst_37 : f32 to vector<2x32xf32>
    %65 = arith.addf %64, %63 : vector<2x32xf32>
    %66 = arith.divf %64, %65 : vector<2x32xf32>
    %67 = vector.extract_strided_slice %60 {offsets = [0, 32], sizes = [2, 32], strides = [1, 1]} : vector<2x128xf32> to vector<2x32xf32>
    %68 = arith.negf %67 : vector<2x32xf32>
    %69 = math.exp %68 : vector<2x32xf32>
    %cst_38 = arith.constant 1.000000e+00 : f32
    %70 = vector.broadcast %cst_38 : f32 to vector<2x32xf32>
    %71 = arith.addf %70, %69 : vector<2x32xf32>
    %72 = arith.divf %70, %71 : vector<2x32xf32>
    %73 = vector.extract_strided_slice %60 {offsets = [0, 64], sizes = [2, 32], strides = [1, 1]} : vector<2x128xf32> to vector<2x32xf32>
    %74 = math.tanh %73 : vector<2x32xf32>
    %75 = vector.extract_strided_slice %60 {offsets = [0, 96], sizes = [2, 32], strides = [1, 1]} : vector<2x128xf32> to vector<2x32xf32>
    %76 = arith.negf %75 : vector<2x32xf32>
    %77 = math.exp %76 : vector<2x32xf32>
    %cst_39 = arith.constant 1.000000e+00 : f32
    %78 = vector.broadcast %cst_39 : f32 to vector<2x32xf32>
    %79 = arith.addf %78, %77 : vector<2x32xf32>
    %80 = arith.divf %78, %79 : vector<2x32xf32>
    %81 = arith.mulf %72, %48 : vector<2x32xf32>
    %82 = arith.mulf %66, %74 : vector<2x32xf32>
    %83 = arith.addf %81, %82 : vector<2x32xf32>
    %84 = math.tanh %83 : vector<2x32xf32>
    %85 = arith.mulf %80, %84 : vector<2x32xf32>
    %c2_i32_40 = arith.constant 2 : i32
    %86 = arith.muli %c1_i32, %c2_i32_40 : i32
    %87 = arith.index_cast %86 : i32 to index
    %c0_41 = arith.constant 0 : index
    %88 = vector.load %arg8[%87, %c0_41] : memref<16x32xf32, #tpu.memory_space<vmem>>, vector<2x32xf32>
    tpu.vector_store %arg8[%87, %c0_41], %85 {strides = array<i32>} : memref<16x32xf32, #tpu.memory_space<vmem>>, vector<2x32xf32>,
    %c2_i32_42 = arith.constant 2 : i32
    %c2_i32_43 = arith.constant 2 : i32
    %89 = arith.muli %c2_i32_42, %c2_i32_43 : i32
    %90 = arith.index_cast %89 : i32 to index
    %c0_44 = arith.constant 0 : index
    %91 = vector.load %arg9[%90, %c0_44] : memref<16x128xf32, #tpu.memory_space<vmem>>, vector<2x128xf32>
    %c0_45 = arith.constant 0 : index
    %c0_46 = arith.constant 0 : index
    %c0_47 = arith.constant 0 : index
    %92 = vector.load %arg5[%c0_45, %c0_46, %c0_47] : memref<2x32x128xf32, #tpu.memory_space<vmem>>, vector<1x32x128xf32>
    %93 = vector.shape_cast %92 : vector<1x32x128xf32> to vector<32x128xf32>
    %cst_48 = arith.constant dense<0.000000e+00> : vector<2x128xf32>
    %94 = tpu.matmul %85, %93, %cst_48 {dimension_numbers = #tpu.dot_dimension_numbers<[1], [0], [0], [1], [0, 0, 1, 1], [], []>} : vector<2x32xf32>, vector<32x128xf32>, vector<2x128xf32> -> vector<2x128xf32>
    %95 = arith.addf %91, %94 : vector<2x128xf32>
    %96 = vector.extract_strided_slice %95 {offsets = [0, 0], sizes = [2, 32], strides = [1, 1]} : vector<2x128xf32> to vector<2x32xf32>
    %97 = arith.negf %96 : vector<2x32xf32>
    %98 = math.exp %97 : vector<2x32xf32>
    %cst_49 = arith.constant 1.000000e+00 : f32
    %99 = vector.broadcast %cst_49 : f32 to vector<2x32xf32>
    %100 = arith.addf %99, %98 : vector<2x32xf32>
    %101 = arith.divf %99, %100 : vector<2x32xf32>
    %102 = vector.extract_strided_slice %95 {offsets = [0, 32], sizes = [2, 32], strides = [1, 1]} : vector<2x128xf32> to vector<2x32xf32>
    %103 = arith.negf %102 : vector<2x32xf32>
    %104 = math.exp %103 : vector<2x32xf32>
    %cst_50 = arith.constant 1.000000e+00 : f32
    %105 = vector.broadcast %cst_50 : f32 to vector<2x32xf32>
    %106 = arith.addf %105, %104 : vector<2x32xf32>
    %107 = arith.divf %105, %106 : vector<2x32xf32>
    %108 = vector.extract_strided_slice %95 {offsets = [0, 64], sizes = [2, 32], strides = [1, 1]} : vector<2x128xf32> to vector<2x32xf32>
    %109 = math.tanh %108 : vector<2x32xf32>
    %110 = vector.extract_strided_slice %95 {offsets = [0, 96], sizes = [2, 32], strides = [1, 1]} : vector<2x128xf32> to vector<2x32xf32>
    %111 = arith.negf %110 : vector<2x32xf32>
    %112 = math.exp %111 : vector<2x32xf32>
    %cst_51 = arith.constant 1.000000e+00 : f32
    %113 = vector.broadcast %cst_51 : f32 to vector<2x32xf32>
    %114 = arith.addf %113, %112 : vector<2x32xf32>
    %115 = arith.divf %113, %114 : vector<2x32xf32>
    %116 = arith.mulf %107, %83 : vector<2x32xf32>
    %117 = arith.mulf %101, %109 : vector<2x32xf32>
    %118 = arith.addf %116, %117 : vector<2x32xf32>
    %119 = math.tanh %118 : vector<2x32xf32>
    %120 = arith.mulf %115, %119 : vector<2x32xf32>
    %c2_i32_52 = arith.constant 2 : i32
    %121 = arith.muli %c2_i32_42, %c2_i32_52 : i32
    %122 = arith.index_cast %121 : i32 to index
    %c0_53 = arith.constant 0 : index
    %123 = vector.load %arg8[%122, %c0_53] : memref<16x32xf32, #tpu.memory_space<vmem>>, vector<2x32xf32>
    tpu.vector_store %arg8[%122, %c0_53], %120 {strides = array<i32>} : memref<16x32xf32, #tpu.memory_space<vmem>>, vector<2x32xf32>,
    %c3_i32 = arith.constant 3 : i32
    %c2_i32_54 = arith.constant 2 : i32
    %124 = arith.muli %c3_i32, %c2_i32_54 : i32
    %125 = arith.index_cast %124 : i32 to index
    %c0_55 = arith.constant 0 : index
    %126 = vector.load %arg9[%125, %c0_55] : memref<16x128xf32, #tpu.memory_space<vmem>>, vector<2x128xf32>
    %c0_56 = arith.constant 0 : index
    %c0_57 = arith.constant 0 : index
    %c0_58 = arith.constant 0 : index
    %127 = vector.load %arg5[%c0_56, %c0_57, %c0_58] : memref<2x32x128xf32, #tpu.memory_space<vmem>>, vector<1x32x128xf32>
    %128 = vector.shape_cast %127 : vector<1x32x128xf32> to vector<32x128xf32>
    %cst_59 = arith.constant dense<0.000000e+00> : vector<2x128xf32>
    %129 = tpu.matmul %120, %128, %cst_59 {dimension_numbers = #tpu.dot_dimension_numbers<[1], [0], [0], [1], [0, 0, 1, 1], [], []>} : vector<2x32xf32>, vector<32x128xf32>, vector<2x128xf32> -> vector<2x128xf32>
    %130 = arith.addf %126, %129 : vector<2x128xf32>
    %131 = vector.extract_strided_slice %130 {offsets = [0, 0], sizes = [2, 32], strides = [1, 1]} : vector<2x128xf32> to vector<2x32xf32>
    %132 = arith.negf %131 : vector<2x32xf32>
    %133 = math.exp %132 : vector<2x32xf32>
    %cst_60 = arith.constant 1.000000e+00 : f32
    %134 = vector.broadcast %cst_60 : f32 to vector<2x32xf32>
    %135 = arith.addf %134, %133 : vector<2x32xf32>
    %136 = arith.divf %134, %135 : vector<2x32xf32>
    %137 = vector.extract_strided_slice %130 {offsets = [0, 32], sizes = [2, 32], strides = [1, 1]} : vector<2x128xf32> to vector<2x32xf32>
    %138 = arith.negf %137 : vector<2x32xf32>
    %139 = math.exp %138 : vector<2x32xf32>
    %cst_61 = arith.constant 1.000000e+00 : f32
    %140 = vector.broadcast %cst_61 : f32 to vector<2x32xf32>
    %141 = arith.addf %140, %139 : vector<2x32xf32>
    %142 = arith.divf %140, %141 : vector<2x32xf32>
    %143 = vector.extract_strided_slice %130 {offsets = [0, 64], sizes = [2, 32], strides = [1, 1]} : vector<2x128xf32> to vector<2x32xf32>
    %144 = math.tanh %143 : vector<2x32xf32>
    %145 = vector.extract_strided_slice %130 {offsets = [0, 96], sizes = [2, 32], strides = [1, 1]} : vector<2x128xf32> to vector<2x32xf32>
    %146 = arith.negf %145 : vector<2x32xf32>
    %147 = math.exp %146 : vector<2x32xf32>
    %cst_62 = arith.constant 1.000000e+00 : f32
    %148 = vector.broadcast %cst_62 : f32 to vector<2x32xf32>
    %149 = arith.addf %148, %147 : vector<2x32xf32>
    %150 = arith.divf %148, %149 : vector<2x32xf32>
    %151 = arith.mulf %142, %118 : vector<2x32xf32>
    %152 = arith.mulf %136, %144 : vector<2x32xf32>
    %153 = arith.addf %151, %152 : vector<2x32xf32>
    %154 = math.tanh %153 : vector<2x32xf32>
    %155 = arith.mulf %150, %154 : vector<2x32xf32>
    %c2_i32_63 = arith.constant 2 : i32
    %156 = arith.muli %c3_i32, %c2_i32_63 : i32
    %157 = arith.index_cast %156 : i32 to index
    %c0_64 = arith.constant 0 : index
    %158 = vector.load %arg8[%157, %c0_64] : memref<16x32xf32, #tpu.memory_space<vmem>>, vector<2x32xf32>
    tpu.vector_store %arg8[%157, %c0_64], %155 {strides = array<i32>} : memref<16x32xf32, #tpu.memory_space<vmem>>, vector<2x32xf32>,
    %c4_i32 = arith.constant 4 : i32
    %c2_i32_65 = arith.constant 2 : i32
    %159 = arith.muli %c4_i32, %c2_i32_65 : i32
    %160 = arith.index_cast %159 : i32 to index
    %c0_66 = arith.constant 0 : index
    %161 = vector.load %arg9[%160, %c0_66] : memref<16x128xf32, #tpu.memory_space<vmem>>, vector<2x128xf32>
    %c0_67 = arith.constant 0 : index
    %c0_68 = arith.constant 0 : index
    %c0_69 = arith.constant 0 : index
    %162 = vector.load %arg5[%c0_67, %c0_68, %c0_69] : memref<2x32x128xf32, #tpu.memory_space<vmem>>, vector<1x32x128xf32>
    %163 = vector.shape_cast %162 : vector<1x32x128xf32> to vector<32x128xf32>
    %cst_70 = arith.constant dense<0.000000e+00> : vector<2x128xf32>
    %164 = tpu.matmul %155, %163, %cst_70 {dimension_numbers = #tpu.dot_dimension_numbers<[1], [0], [0], [1], [0, 0, 1, 1], [], []>} : vector<2x32xf32>, vector<32x128xf32>, vector<2x128xf32> -> vector<2x128xf32>
    %165 = arith.addf %161, %164 : vector<2x128xf32>
    %166 = vector.extract_strided_slice %165 {offsets = [0, 0], sizes = [2, 32], strides = [1, 1]} : vector<2x128xf32> to vector<2x32xf32>
    %167 = arith.negf %166 : vector<2x32xf32>
    %168 = math.exp %167 : vector<2x32xf32>
    %cst_71 = arith.constant 1.000000e+00 : f32
    %169 = vector.broadcast %cst_71 : f32 to vector<2x32xf32>
    %170 = arith.addf %169, %168 : vector<2x32xf32>
    %171 = arith.divf %169, %170 : vector<2x32xf32>
    %172 = vector.extract_strided_slice %165 {offsets = [0, 32], sizes = [2, 32], strides = [1, 1]} : vector<2x128xf32> to vector<2x32xf32>
    %173 = arith.negf %172 : vector<2x32xf32>
    %174 = math.exp %173 : vector<2x32xf32>
    %cst_72 = arith.constant 1.000000e+00 : f32
    %175 = vector.broadcast %cst_72 : f32 to vector<2x32xf32>
    %176 = arith.addf %175, %174 : vector<2x32xf32>
    %177 = arith.divf %175, %176 : vector<2x32xf32>
    %178 = vector.extract_strided_slice %165 {offsets = [0, 64], sizes = [2, 32], strides = [1, 1]} : vector<2x128xf32> to vector<2x32xf32>
    %179 = math.tanh %178 : vector<2x32xf32>
    %180 = vector.extract_strided_slice %165 {offsets = [0, 96], sizes = [2, 32], strides = [1, 1]} : vector<2x128xf32> to vector<2x32xf32>
    %181 = arith.negf %180 : vector<2x32xf32>
    %182 = math.exp %181 : vector<2x32xf32>
    %cst_73 = arith.constant 1.000000e+00 : f32
    %183 = vector.broadcast %cst_73 : f32 to vector<2x32xf32>
    %184 = arith.addf %183, %182 : vector<2x32xf32>
    %185 = arith.divf %183, %184 : vector<2x32xf32>
    %186 = arith.mulf %177, %153 : vector<2x32xf32>
    %187 = arith.mulf %171, %179 : vector<2x32xf32>
    %188 = arith.addf %186, %187 : vector<2x32xf32>
    %189 = math.tanh %188 : vector<2x32xf32>
    %190 = arith.mulf %185, %189 : vector<2x32xf32>
    %c2_i32_74 = arith.constant 2 : i32
    %191 = arith.muli %c4_i32, %c2_i32_74 : i32
    %192 = arith.index_cast %191 : i32 to index
    %c0_75 = arith.constant 0 : index
    %193 = vector.load %arg8[%192, %c0_75] : memref<16x32xf32, #tpu.memory_space<vmem>>, vector<2x32xf32>
    tpu.vector_store %arg8[%192, %c0_75], %190 {strides = array<i32>} : memref<16x32xf32, #tpu.memory_space<vmem>>, vector<2x32xf32>,
    %c5_i32 = arith.constant 5 : i32
    %c2_i32_76 = arith.constant 2 : i32
    %194 = arith.muli %c5_i32, %c2_i32_76 : i32
    %195 = arith.index_cast %194 : i32 to index
    %c0_77 = arith.constant 0 : index
    %196 = vector.load %arg9[%195, %c0_77] : memref<16x128xf32, #tpu.memory_space<vmem>>, vector<2x128xf32>
    %c0_78 = arith.constant 0 : index
    %c0_79 = arith.constant 0 : index
    %c0_80 = arith.constant 0 : index
    %197 = vector.load %arg5[%c0_78, %c0_79, %c0_80] : memref<2x32x128xf32, #tpu.memory_space<vmem>>, vector<1x32x128xf32>
    %198 = vector.shape_cast %197 : vector<1x32x128xf32> to vector<32x128xf32>
    %cst_81 = arith.constant dense<0.000000e+00> : vector<2x128xf32>
    %199 = tpu.matmul %190, %198, %cst_81 {dimension_numbers = #tpu.dot_dimension_numbers<[1], [0], [0], [1], [0, 0, 1, 1], [], []>} : vector<2x32xf32>, vector<32x128xf32>, vector<2x128xf32> -> vector<2x128xf32>
    %200 = arith.addf %196, %199 : vector<2x128xf32>
    %201 = vector.extract_strided_slice %200 {offsets = [0, 0], sizes = [2, 32], strides = [1, 1]} : vector<2x128xf32> to vector<2x32xf32>
    %202 = arith.negf %201 : vector<2x32xf32>
    %203 = math.exp %202 : vector<2x32xf32>
    %cst_82 = arith.constant 1.000000e+00 : f32
    %204 = vector.broadcast %cst_82 : f32 to vector<2x32xf32>
    %205 = arith.addf %204, %203 : vector<2x32xf32>
    %206 = arith.divf %204, %205 : vector<2x32xf32>
    %207 = vector.extract_strided_slice %200 {offsets = [0, 32], sizes = [2, 32], strides = [1, 1]} : vector<2x128xf32> to vector<2x32xf32>
    %208 = arith.negf %207 : vector<2x32xf32>
    %209 = math.exp %208 : vector<2x32xf32>
    %cst_83 = arith.constant 1.000000e+00 : f32
    %210 = vector.broadcast %cst_83 : f32 to vector<2x32xf32>
    %211 = arith.addf %210, %209 : vector<2x32xf32>
    %212 = arith.divf %210, %211 : vector<2x32xf32>
    %213 = vector.extract_strided_slice %200 {offsets = [0, 64], sizes = [2, 32], strides = [1, 1]} : vector<2x128xf32> to vector<2x32xf32>
    %214 = math.tanh %213 : vector<2x32xf32>
    %215 = vector.extract_strided_slice %200 {offsets = [0, 96], sizes = [2, 32], strides = [1, 1]} : vector<2x128xf32> to vector<2x32xf32>
    %216 = arith.negf %215 : vector<2x32xf32>
    %217 = math.exp %216 : vector<2x32xf32>
    %cst_84 = arith.constant 1.000000e+00 : f32
    %218 = vector.broadcast %cst_84 : f32 to vector<2x32xf32>
    %219 = arith.addf %218, %217 : vector<2x32xf32>
    %220 = arith.divf %218, %219 : vector<2x32xf32>
    %221 = arith.mulf %212, %188 : vector<2x32xf32>
    %222 = arith.mulf %206, %214 : vector<2x32xf32>
    %223 = arith.addf %221, %222 : vector<2x32xf32>
    %224 = math.tanh %223 : vector<2x32xf32>
    %225 = arith.mulf %220, %224 : vector<2x32xf32>
    %c2_i32_85 = arith.constant 2 : i32
    %226 = arith.muli %c5_i32, %c2_i32_85 : i32
    %227 = arith.index_cast %226 : i32 to index
    %c0_86 = arith.constant 0 : index
    %228 = vector.load %arg8[%227, %c0_86] : memref<16x32xf32, #tpu.memory_space<vmem>>, vector<2x32xf32>
    tpu.vector_store %arg8[%227, %c0_86], %225 {strides = array<i32>} : memref<16x32xf32, #tpu.memory_space<vmem>>, vector<2x32xf32>,
    %c6_i32 = arith.constant 6 : i32
    %c2_i32_87 = arith.constant 2 : i32
    %229 = arith.muli %c6_i32, %c2_i32_87 : i32
    %230 = arith.index_cast %229 : i32 to index
    %c0_88 = arith.constant 0 : index
    %231 = vector.load %arg9[%230, %c0_88] : memref<16x128xf32, #tpu.memory_space<vmem>>, vector<2x128xf32>
    %c0_89 = arith.constant 0 : index
    %c0_90 = arith.constant 0 : index
    %c0_91 = arith.constant 0 : index
    %232 = vector.load %arg5[%c0_89, %c0_90, %c0_91] : memref<2x32x128xf32, #tpu.memory_space<vmem>>, vector<1x32x128xf32>
    %233 = vector.shape_cast %232 : vector<1x32x128xf32> to vector<32x128xf32>
    %cst_92 = arith.constant dense<0.000000e+00> : vector<2x128xf32>
    %234 = tpu.matmul %225, %233, %cst_92 {dimension_numbers = #tpu.dot_dimension_numbers<[1], [0], [0], [1], [0, 0, 1, 1], [], []>} : vector<2x32xf32>, vector<32x128xf32>, vector<2x128xf32> -> vector<2x128xf32>
    %235 = arith.addf %231, %234 : vector<2x128xf32>
    %236 = vector.extract_strided_slice %235 {offsets = [0, 0], sizes = [2, 32], strides = [1, 1]} : vector<2x128xf32> to vector<2x32xf32>
    %237 = arith.negf %236 : vector<2x32xf32>
    %238 = math.exp %237 : vector<2x32xf32>
    %cst_93 = arith.constant 1.000000e+00 : f32
    %239 = vector.broadcast %cst_93 : f32 to vector<2x32xf32>
    %240 = arith.addf %239, %238 : vector<2x32xf32>
    %241 = arith.divf %239, %240 : vector<2x32xf32>
    %242 = vector.extract_strided_slice %235 {offsets = [0, 32], sizes = [2, 32], strides = [1, 1]} : vector<2x128xf32> to vector<2x32xf32>
    %243 = arith.negf %242 : vector<2x32xf32>
    %244 = math.exp %243 : vector<2x32xf32>
    %cst_94 = arith.constant 1.000000e+00 : f32
    %245 = vector.broadcast %cst_94 : f32 to vector<2x32xf32>
    %246 = arith.addf %245, %244 : vector<2x32xf32>
    %247 = arith.divf %245, %246 : vector<2x32xf32>
    %248 = vector.extract_strided_slice %235 {offsets = [0, 64], sizes = [2, 32], strides = [1, 1]} : vector<2x128xf32> to vector<2x32xf32>
    %249 = math.tanh %248 : vector<2x32xf32>
    %250 = vector.extract_strided_slice %235 {offsets = [0, 96], sizes = [2, 32], strides = [1, 1]} : vector<2x128xf32> to vector<2x32xf32>
    %251 = arith.negf %250 : vector<2x32xf32>
    %252 = math.exp %251 : vector<2x32xf32>
    %cst_95 = arith.constant 1.000000e+00 : f32
    %253 = vector.broadcast %cst_95 : f32 to vector<2x32xf32>
    %254 = arith.addf %253, %252 : vector<2x32xf32>
    %255 = arith.divf %253, %254 : vector<2x32xf32>
    %256 = arith.mulf %247, %223 : vector<2x32xf32>
    %257 = arith.mulf %241, %249 : vector<2x32xf32>
    %258 = arith.addf %256, %257 : vector<2x32xf32>
    %259 = math.tanh %258 : vector<2x32xf32>
    %260 = arith.mulf %255, %259 : vector<2x32xf32>
    %c2_i32_96 = arith.constant 2 : i32
    %261 = arith.muli %c6_i32, %c2_i32_96 : i32
    %262 = arith.index_cast %261 : i32 to index
    %c0_97 = arith.constant 0 : index
    %263 = vector.load %arg8[%262, %c0_97] : memref<16x32xf32, #tpu.memory_space<vmem>>, vector<2x32xf32>
    tpu.vector_store %arg8[%262, %c0_97], %260 {strides = array<i32>} : memref<16x32xf32, #tpu.memory_space<vmem>>, vector<2x32xf32>,
    %c7_i32 = arith.constant 7 : i32
    %c2_i32_98 = arith.constant 2 : i32
    %264 = arith.muli %c7_i32, %c2_i32_98 : i32
    %265 = arith.index_cast %264 : i32 to index
    %c0_99 = arith.constant 0 : index
    %266 = vector.load %arg9[%265, %c0_99] : memref<16x128xf32, #tpu.memory_space<vmem>>, vector<2x128xf32>
    %c0_100 = arith.constant 0 : index
    %c0_101 = arith.constant 0 : index
    %c0_102 = arith.constant 0 : index
    %267 = vector.load %arg5[%c0_100, %c0_101, %c0_102] : memref<2x32x128xf32, #tpu.memory_space<vmem>>, vector<1x32x128xf32>
    %268 = vector.shape_cast %267 : vector<1x32x128xf32> to vector<32x128xf32>
    %cst_103 = arith.constant dense<0.000000e+00> : vector<2x128xf32>
    %269 = tpu.matmul %260, %268, %cst_103 {dimension_numbers = #tpu.dot_dimension_numbers<[1], [0], [0], [1], [0, 0, 1, 1], [], []>} : vector<2x32xf32>, vector<32x128xf32>, vector<2x128xf32> -> vector<2x128xf32>
    %270 = arith.addf %266, %269 : vector<2x128xf32>
    %271 = vector.extract_strided_slice %270 {offsets = [0, 0], sizes = [2, 32], strides = [1, 1]} : vector<2x128xf32> to vector<2x32xf32>
    %272 = arith.negf %271 : vector<2x32xf32>
    %273 = math.exp %272 : vector<2x32xf32>
    %cst_104 = arith.constant 1.000000e+00 : f32
    %274 = vector.broadcast %cst_104 : f32 to vector<2x32xf32>
    %275 = arith.addf %274, %273 : vector<2x32xf32>
    %276 = arith.divf %274, %275 : vector<2x32xf32>
    %277 = vector.extract_strided_slice %270 {offsets = [0, 32], sizes = [2, 32], strides = [1, 1]} : vector<2x128xf32> to vector<2x32xf32>
    %278 = arith.negf %277 : vector<2x32xf32>
    %279 = math.exp %278 : vector<2x32xf32>
    %cst_105 = arith.constant 1.000000e+00 : f32
    %280 = vector.broadcast %cst_105 : f32 to vector<2x32xf32>
    %281 = arith.addf %280, %279 : vector<2x32xf32>
    %282 = arith.divf %280, %281 : vector<2x32xf32>
    %283 = vector.extract_strided_slice %270 {offsets = [0, 64], sizes = [2, 32], strides = [1, 1]} : vector<2x128xf32> to vector<2x32xf32>
    %284 = math.tanh %283 : vector<2x32xf32>
    %285 = vector.extract_strided_slice %270 {offsets = [0, 96], sizes = [2, 32], strides = [1, 1]} : vector<2x128xf32> to vector<2x32xf32>
    %286 = arith.negf %285 : vector<2x32xf32>
    %287 = math.exp %286 : vector<2x32xf32>
    %cst_106 = arith.constant 1.000000e+00 : f32
    %288 = vector.broadcast %cst_106 : f32 to vector<2x32xf32>
    %289 = arith.addf %288, %287 : vector<2x32xf32>
    %290 = arith.divf %288, %289 : vector<2x32xf32>
    %291 = arith.mulf %282, %258 : vector<2x32xf32>
    %292 = arith.mulf %276, %284 : vector<2x32xf32>
    %293 = arith.addf %291, %292 : vector<2x32xf32>
    %294 = math.tanh %293 : vector<2x32xf32>
    %295 = arith.mulf %290, %294 : vector<2x32xf32>
    %c2_i32_107 = arith.constant 2 : i32
    %296 = arith.muli %c7_i32, %c2_i32_107 : i32
    %297 = arith.index_cast %296 : i32 to index
    %c0_108 = arith.constant 0 : index
    %298 = vector.load %arg8[%297, %c0_108] : memref<16x32xf32, #tpu.memory_space<vmem>>, vector<2x32xf32>
    tpu.vector_store %arg8[%297, %c0_108], %295 {strides = array<i32>} : memref<16x32xf32, #tpu.memory_space<vmem>>, vector<2x32xf32>,
    %c8_i32 = arith.constant 8 : i32
    %c0_109 = arith.constant 0 : index
    %c0_110 = arith.constant 0 : index
    %299 = vector.load %arg8[%c0_109, %c0_110] : memref<16x32xf32, #tpu.memory_space<vmem>>, vector<16x32xf32>
    %c1 = arith.constant 1 : index
    %c0_111 = arith.constant 0 : index
    %c0_112 = arith.constant 0 : index
    %300 = vector.load %arg4[%c1, %c0_111, %c0_112] : memref<2x32x128xf32, #tpu.memory_space<vmem>>, vector<1x32x128xf32>
    %301 = vector.shape_cast %300 : vector<1x32x128xf32> to vector<32x128xf32>
    %cst_113 = arith.constant dense<0.000000e+00> : vector<16x128xf32>
    %302 = tpu.matmul %299, %301, %cst_113 {dimension_numbers = #tpu.dot_dimension_numbers<[1], [0], [0], [1], [0, 0, 1, 1], [], []>} : vector<16x32xf32>, vector<32x128xf32>, vector<16x128xf32> -> vector<16x128xf32>
    %c1_114 = arith.constant 1 : index
    %c0_115 = arith.constant 0 : index
    %c0_116 = arith.constant 0 : index
    %303 = vector.load %arg6[%c1_114, %c0_115, %c0_116] : memref<2x1x128xf32, #tpu.memory_space<vmem>>, vector<1x1x128xf32>
    %304 = vector.shape_cast %303 : vector<1x1x128xf32> to vector<1x128xf32>
    %305 = vector.broadcast %304 : vector<1x128xf32> to vector<16x128xf32>
    %306 = arith.addf %302, %305 : vector<16x128xf32>
    %c0_117 = arith.constant 0 : index
    %c0_118 = arith.constant 0 : index
    %307 = vector.load %arg9[%c0_117, %c0_118] : memref<16x128xf32, #tpu.memory_space<vmem>>, vector<16x128xf32>
    tpu.vector_store %arg9[%c0_117, %c0_118], %306 {strides = array<i32>} : memref<16x128xf32, #tpu.memory_space<vmem>>, vector<16x128xf32>,
    %cst_119 = arith.constant 0.000000e+00 : f32
    %308 = vector.broadcast %cst_119 : f32 to vector<2x32xf32>
    %cst_120 = arith.constant 0.000000e+00 : f32
    %309 = vector.broadcast %cst_120 : f32 to vector<2x32xf32>
    %c0_i32_121 = arith.constant 0 : i32
    %c2_i32_122 = arith.constant 2 : i32
    %310 = arith.muli %c0_i32_121, %c2_i32_122 : i32
    %311 = arith.index_cast %310 : i32 to index
    %c0_123 = arith.constant 0 : index
    %312 = vector.load %arg9[%311, %c0_123] : memref<16x128xf32, #tpu.memory_space<vmem>>, vector<2x128xf32>
    %c1_124 = arith.constant 1 : index
    %c0_125 = arith.constant 0 : index
    %c0_126 = arith.constant 0 : index
    %313 = vector.load %arg5[%c1_124, %c0_125, %c0_126] : memref<2x32x128xf32, #tpu.memory_space<vmem>>, vector<1x32x128xf32>
    %314 = vector.shape_cast %313 : vector<1x32x128xf32> to vector<32x128xf32>
    %cst_127 = arith.constant dense<0.000000e+00> : vector<2x128xf32>
    %315 = tpu.matmul %308, %314, %cst_127 {dimension_numbers = #tpu.dot_dimension_numbers<[1], [0], [0], [1], [0, 0, 1, 1], [], []>} : vector<2x32xf32>, vector<32x128xf32>, vector<2x128xf32> -> vector<2x128xf32>
    %316 = arith.addf %312, %315 : vector<2x128xf32>
    %317 = vector.extract_strided_slice %316 {offsets = [0, 0], sizes = [2, 32], strides = [1, 1]} : vector<2x128xf32> to vector<2x32xf32>
    %318 = arith.negf %317 : vector<2x32xf32>
    %319 = math.exp %318 : vector<2x32xf32>
    %cst_128 = arith.constant 1.000000e+00 : f32
    %320 = vector.broadcast %cst_128 : f32 to vector<2x32xf32>
    %321 = arith.addf %320, %319 : vector<2x32xf32>
    %322 = arith.divf %320, %321 : vector<2x32xf32>
    %323 = vector.extract_strided_slice %316 {offsets = [0, 32], sizes = [2, 32], strides = [1, 1]} : vector<2x128xf32> to vector<2x32xf32>
    %324 = arith.negf %323 : vector<2x32xf32>
    %325 = math.exp %324 : vector<2x32xf32>
    %cst_129 = arith.constant 1.000000e+00 : f32
    %326 = vector.broadcast %cst_129 : f32 to vector<2x32xf32>
    %327 = arith.addf %326, %325 : vector<2x32xf32>
    %328 = arith.divf %326, %327 : vector<2x32xf32>
    %329 = vector.extract_strided_slice %316 {offsets = [0, 64], sizes = [2, 32], strides = [1, 1]} : vector<2x128xf32> to vector<2x32xf32>
    %330 = math.tanh %329 : vector<2x32xf32>
    %331 = vector.extract_strided_slice %316 {offsets = [0, 96], sizes = [2, 32], strides = [1, 1]} : vector<2x128xf32> to vector<2x32xf32>
    %332 = arith.negf %331 : vector<2x32xf32>
    %333 = math.exp %332 : vector<2x32xf32>
    %cst_130 = arith.constant 1.000000e+00 : f32
    %334 = vector.broadcast %cst_130 : f32 to vector<2x32xf32>
    %335 = arith.addf %334, %333 : vector<2x32xf32>
    %336 = arith.divf %334, %335 : vector<2x32xf32>
    %337 = arith.mulf %328, %309 : vector<2x32xf32>
    %338 = arith.mulf %322, %330 : vector<2x32xf32>
    %339 = arith.addf %337, %338 : vector<2x32xf32>
    %340 = math.tanh %339 : vector<2x32xf32>
    %341 = arith.mulf %336, %340 : vector<2x32xf32>
    %c2_i32_131 = arith.constant 2 : i32
    %342 = arith.muli %c0_i32_121, %c2_i32_131 : i32
    %343 = arith.index_cast %342 : i32 to index
    %c0_132 = arith.constant 0 : index
    %344 = vector.load %arg8[%343, %c0_132] : memref<16x32xf32, #tpu.memory_space<vmem>>, vector<2x32xf32>
    tpu.vector_store %arg8[%343, %c0_132], %341 {strides = array<i32>} : memref<16x32xf32, #tpu.memory_space<vmem>>, vector<2x32xf32>,
    %c1_i32_133 = arith.constant 1 : i32
    %c2_i32_134 = arith.constant 2 : i32
    %345 = arith.muli %c1_i32_133, %c2_i32_134 : i32
    %346 = arith.index_cast %345 : i32 to index
    %c0_135 = arith.constant 0 : index
    %347 = vector.load %arg9[%346, %c0_135] : memref<16x128xf32, #tpu.memory_space<vmem>>, vector<2x128xf32>
    %c1_136 = arith.constant 1 : index
    %c0_137 = arith.constant 0 : index
    %c0_138 = arith.constant 0 : index
    %348 = vector.load %arg5[%c1_136, %c0_137, %c0_138] : memref<2x32x128xf32, #tpu.memory_space<vmem>>, vector<1x32x128xf32>
    %349 = vector.shape_cast %348 : vector<1x32x128xf32> to vector<32x128xf32>
    %cst_139 = arith.constant dense<0.000000e+00> : vector<2x128xf32>
    %350 = tpu.matmul %341, %349, %cst_139 {dimension_numbers = #tpu.dot_dimension_numbers<[1], [0], [0], [1], [0, 0, 1, 1], [], []>} : vector<2x32xf32>, vector<32x128xf32>, vector<2x128xf32> -> vector<2x128xf32>
    %351 = arith.addf %347, %350 : vector<2x128xf32>
    %352 = vector.extract_strided_slice %351 {offsets = [0, 0], sizes = [2, 32], strides = [1, 1]} : vector<2x128xf32> to vector<2x32xf32>
    %353 = arith.negf %352 : vector<2x32xf32>
    %354 = math.exp %353 : vector<2x32xf32>
    %cst_140 = arith.constant 1.000000e+00 : f32
    %355 = vector.broadcast %cst_140 : f32 to vector<2x32xf32>
    %356 = arith.addf %355, %354 : vector<2x32xf32>
    %357 = arith.divf %355, %356 : vector<2x32xf32>
    %358 = vector.extract_strided_slice %351 {offsets = [0, 32], sizes = [2, 32], strides = [1, 1]} : vector<2x128xf32> to vector<2x32xf32>
    %359 = arith.negf %358 : vector<2x32xf32>
    %360 = math.exp %359 : vector<2x32xf32>
    %cst_141 = arith.constant 1.000000e+00 : f32
    %361 = vector.broadcast %cst_141 : f32 to vector<2x32xf32>
    %362 = arith.addf %361, %360 : vector<2x32xf32>
    %363 = arith.divf %361, %362 : vector<2x32xf32>
    %364 = vector.extract_strided_slice %351 {offsets = [0, 64], sizes = [2, 32], strides = [1, 1]} : vector<2x128xf32> to vector<2x32xf32>
    %365 = math.tanh %364 : vector<2x32xf32>
    %366 = vector.extract_strided_slice %351 {offsets = [0, 96], sizes = [2, 32], strides = [1, 1]} : vector<2x128xf32> to vector<2x32xf32>
    %367 = arith.negf %366 : vector<2x32xf32>
    %368 = math.exp %367 : vector<2x32xf32>
    %cst_142 = arith.constant 1.000000e+00 : f32
    %369 = vector.broadcast %cst_142 : f32 to vector<2x32xf32>
    %370 = arith.addf %369, %368 : vector<2x32xf32>
    %371 = arith.divf %369, %370 : vector<2x32xf32>
    %372 = arith.mulf %363, %339 : vector<2x32xf32>
    %373 = arith.mulf %357, %365 : vector<2x32xf32>
    %374 = arith.addf %372, %373 : vector<2x32xf32>
    %375 = math.tanh %374 : vector<2x32xf32>
    %376 = arith.mulf %371, %375 : vector<2x32xf32>
    %c2_i32_143 = arith.constant 2 : i32
    %377 = arith.muli %c1_i32_133, %c2_i32_143 : i32
    %378 = arith.index_cast %377 : i32 to index
    %c0_144 = arith.constant 0 : index
    %379 = vector.load %arg8[%378, %c0_144] : memref<16x32xf32, #tpu.memory_space<vmem>>, vector<2x32xf32>
    tpu.vector_store %arg8[%378, %c0_144], %376 {strides = array<i32>} : memref<16x32xf32, #tpu.memory_space<vmem>>, vector<2x32xf32>,
    %c2_i32_145 = arith.constant 2 : i32
    %c2_i32_146 = arith.constant 2 : i32
    %380 = arith.muli %c2_i32_145, %c2_i32_146 : i32
    %381 = arith.index_cast %380 : i32 to index
    %c0_147 = arith.constant 0 : index
    %382 = vector.load %arg9[%381, %c0_147] : memref<16x128xf32, #tpu.memory_space<vmem>>, vector<2x128xf32>
    %c1_148 = arith.constant 1 : index
    %c0_149 = arith.constant 0 : index
    %c0_150 = arith.constant 0 : index
    %383 = vector.load %arg5[%c1_148, %c0_149, %c0_150] : memref<2x32x128xf32, #tpu.memory_space<vmem>>, vector<1x32x128xf32>
    %384 = vector.shape_cast %383 : vector<1x32x128xf32> to vector<32x128xf32>
    %cst_151 = arith.constant dense<0.000000e+00> : vector<2x128xf32>
    %385 = tpu.matmul %376, %384, %cst_151 {dimension_numbers = #tpu.dot_dimension_numbers<[1], [0], [0], [1], [0, 0, 1, 1], [], []>} : vector<2x32xf32>, vector<32x128xf32>, vector<2x128xf32> -> vector<2x128xf32>
    %386 = arith.addf %382, %385 : vector<2x128xf32>
    %387 = vector.extract_strided_slice %386 {offsets = [0, 0], sizes = [2, 32], strides = [1, 1]} : vector<2x128xf32> to vector<2x32xf32>
    %388 = arith.negf %387 : vector<2x32xf32>
    %389 = math.exp %388 : vector<2x32xf32>
    %cst_152 = arith.constant 1.000000e+00 : f32
    %390 = vector.broadcast %cst_152 : f32 to vector<2x32xf32>
    %391 = arith.addf %390, %389 : vector<2x32xf32>
    %392 = arith.divf %390, %391 : vector<2x32xf32>
    %393 = vector.extract_strided_slice %386 {offsets = [0, 32], sizes = [2, 32], strides = [1, 1]} : vector<2x128xf32> to vector<2x32xf32>
    %394 = arith.negf %393 : vector<2x32xf32>
    %395 = math.exp %394 : vector<2x32xf32>
    %cst_153 = arith.constant 1.000000e+00 : f32
    %396 = vector.broadcast %cst_153 : f32 to vector<2x32xf32>
    %397 = arith.addf %396, %395 : vector<2x32xf32>
    %398 = arith.divf %396, %397 : vector<2x32xf32>
    %399 = vector.extract_strided_slice %386 {offsets = [0, 64], sizes = [2, 32], strides = [1, 1]} : vector<2x128xf32> to vector<2x32xf32>
    %400 = math.tanh %399 : vector<2x32xf32>
    %401 = vector.extract_strided_slice %386 {offsets = [0, 96], sizes = [2, 32], strides = [1, 1]} : vector<2x128xf32> to vector<2x32xf32>
    %402 = arith.negf %401 : vector<2x32xf32>
    %403 = math.exp %402 : vector<2x32xf32>
    %cst_154 = arith.constant 1.000000e+00 : f32
    %404 = vector.broadcast %cst_154 : f32 to vector<2x32xf32>
    %405 = arith.addf %404, %403 : vector<2x32xf32>
    %406 = arith.divf %404, %405 : vector<2x32xf32>
    %407 = arith.mulf %398, %374 : vector<2x32xf32>
    %408 = arith.mulf %392, %400 : vector<2x32xf32>
    %409 = arith.addf %407, %408 : vector<2x32xf32>
    %410 = math.tanh %409 : vector<2x32xf32>
    %411 = arith.mulf %406, %410 : vector<2x32xf32>
    %c2_i32_155 = arith.constant 2 : i32
    %412 = arith.muli %c2_i32_145, %c2_i32_155 : i32
    %413 = arith.index_cast %412 : i32 to index
    %c0_156 = arith.constant 0 : index
    %414 = vector.load %arg8[%413, %c0_156] : memref<16x32xf32, #tpu.memory_space<vmem>>, vector<2x32xf32>
    tpu.vector_store %arg8[%413, %c0_156], %411 {strides = array<i32>} : memref<16x32xf32, #tpu.memory_space<vmem>>, vector<2x32xf32>,
    %c3_i32_157 = arith.constant 3 : i32
    %c2_i32_158 = arith.constant 2 : i32
    %415 = arith.muli %c3_i32_157, %c2_i32_158 : i32
    %416 = arith.index_cast %415 : i32 to index
    %c0_159 = arith.constant 0 : index
    %417 = vector.load %arg9[%416, %c0_159] : memref<16x128xf32, #tpu.memory_space<vmem>>, vector<2x128xf32>
    %c1_160 = arith.constant 1 : index
    %c0_161 = arith.constant 0 : index
    %c0_162 = arith.constant 0 : index
    %418 = vector.load %arg5[%c1_160, %c0_161, %c0_162] : memref<2x32x128xf32, #tpu.memory_space<vmem>>, vector<1x32x128xf32>
    %419 = vector.shape_cast %418 : vector<1x32x128xf32> to vector<32x128xf32>
    %cst_163 = arith.constant dense<0.000000e+00> : vector<2x128xf32>
    %420 = tpu.matmul %411, %419, %cst_163 {dimension_numbers = #tpu.dot_dimension_numbers<[1], [0], [0], [1], [0, 0, 1, 1], [], []>} : vector<2x32xf32>, vector<32x128xf32>, vector<2x128xf32> -> vector<2x128xf32>
    %421 = arith.addf %417, %420 : vector<2x128xf32>
    %422 = vector.extract_strided_slice %421 {offsets = [0, 0], sizes = [2, 32], strides = [1, 1]} : vector<2x128xf32> to vector<2x32xf32>
    %423 = arith.negf %422 : vector<2x32xf32>
    %424 = math.exp %423 : vector<2x32xf32>
    %cst_164 = arith.constant 1.000000e+00 : f32
    %425 = vector.broadcast %cst_164 : f32 to vector<2x32xf32>
    %426 = arith.addf %425, %424 : vector<2x32xf32>
    %427 = arith.divf %425, %426 : vector<2x32xf32>
    %428 = vector.extract_strided_slice %421 {offsets = [0, 32], sizes = [2, 32], strides = [1, 1]} : vector<2x128xf32> to vector<2x32xf32>
    %429 = arith.negf %428 : vector<2x32xf32>
    %430 = math.exp %429 : vector<2x32xf32>
    %cst_165 = arith.constant 1.000000e+00 : f32
    %431 = vector.broadcast %cst_165 : f32 to vector<2x32xf32>
    %432 = arith.addf %431, %430 : vector<2x32xf32>
    %433 = arith.divf %431, %432 : vector<2x32xf32>
    %434 = vector.extract_strided_slice %421 {offsets = [0, 64], sizes = [2, 32], strides = [1, 1]} : vector<2x128xf32> to vector<2x32xf32>
    %435 = math.tanh %434 : vector<2x32xf32>
    %436 = vector.extract_strided_slice %421 {offsets = [0, 96], sizes = [2, 32], strides = [1, 1]} : vector<2x128xf32> to vector<2x32xf32>
    %437 = arith.negf %436 : vector<2x32xf32>
    %438 = math.exp %437 : vector<2x32xf32>
    %cst_166 = arith.constant 1.000000e+00 : f32
    %439 = vector.broadcast %cst_166 : f32 to vector<2x32xf32>
    %440 = arith.addf %439, %438 : vector<2x32xf32>
    %441 = arith.divf %439, %440 : vector<2x32xf32>
    %442 = arith.mulf %433, %409 : vector<2x32xf32>
    %443 = arith.mulf %427, %435 : vector<2x32xf32>
    %444 = arith.addf %442, %443 : vector<2x32xf32>
    %445 = math.tanh %444 : vector<2x32xf32>
    %446 = arith.mulf %441, %445 : vector<2x32xf32>
    %c2_i32_167 = arith.constant 2 : i32
    %447 = arith.muli %c3_i32_157, %c2_i32_167 : i32
    %448 = arith.index_cast %447 : i32 to index
    %c0_168 = arith.constant 0 : index
    %449 = vector.load %arg8[%448, %c0_168] : memref<16x32xf32, #tpu.memory_space<vmem>>, vector<2x32xf32>
    tpu.vector_store %arg8[%448, %c0_168], %446 {strides = array<i32>} : memref<16x32xf32, #tpu.memory_space<vmem>>, vector<2x32xf32>,
    %c4_i32_169 = arith.constant 4 : i32
    %c2_i32_170 = arith.constant 2 : i32
    %450 = arith.muli %c4_i32_169, %c2_i32_170 : i32
    %451 = arith.index_cast %450 : i32 to index
    %c0_171 = arith.constant 0 : index
    %452 = vector.load %arg9[%451, %c0_171] : memref<16x128xf32, #tpu.memory_space<vmem>>, vector<2x128xf32>
    %c1_172 = arith.constant 1 : index
    %c0_173 = arith.constant 0 : index
    %c0_174 = arith.constant 0 : index
    %453 = vector.load %arg5[%c1_172, %c0_173, %c0_174] : memref<2x32x128xf32, #tpu.memory_space<vmem>>, vector<1x32x128xf32>
    %454 = vector.shape_cast %453 : vector<1x32x128xf32> to vector<32x128xf32>
    %cst_175 = arith.constant dense<0.000000e+00> : vector<2x128xf32>
    %455 = tpu.matmul %446, %454, %cst_175 {dimension_numbers = #tpu.dot_dimension_numbers<[1], [0], [0], [1], [0, 0, 1, 1], [], []>} : vector<2x32xf32>, vector<32x128xf32>, vector<2x128xf32> -> vector<2x128xf32>
    %456 = arith.addf %452, %455 : vector<2x128xf32>
    %457 = vector.extract_strided_slice %456 {offsets = [0, 0], sizes = [2, 32], strides = [1, 1]} : vector<2x128xf32> to vector<2x32xf32>
    %458 = arith.negf %457 : vector<2x32xf32>
    %459 = math.exp %458 : vector<2x32xf32>
    %cst_176 = arith.constant 1.000000e+00 : f32
    %460 = vector.broadcast %cst_176 : f32 to vector<2x32xf32>
    %461 = arith.addf %460, %459 : vector<2x32xf32>
    %462 = arith.divf %460, %461 : vector<2x32xf32>
    %463 = vector.extract_strided_slice %456 {offsets = [0, 32], sizes = [2, 32], strides = [1, 1]} : vector<2x128xf32> to vector<2x32xf32>
    %464 = arith.negf %463 : vector<2x32xf32>
    %465 = math.exp %464 : vector<2x32xf32>
    %cst_177 = arith.constant 1.000000e+00 : f32
    %466 = vector.broadcast %cst_177 : f32 to vector<2x32xf32>
    %467 = arith.addf %466, %465 : vector<2x32xf32>
    %468 = arith.divf %466, %467 : vector<2x32xf32>
    %469 = vector.extract_strided_slice %456 {offsets = [0, 64], sizes = [2, 32], strides = [1, 1]} : vector<2x128xf32> to vector<2x32xf32>
    %470 = math.tanh %469 : vector<2x32xf32>
    %471 = vector.extract_strided_slice %456 {offsets = [0, 96], sizes = [2, 32], strides = [1, 1]} : vector<2x128xf32> to vector<2x32xf32>
    %472 = arith.negf %471 : vector<2x32xf32>
    %473 = math.exp %472 : vector<2x32xf32>
    %cst_178 = arith.constant 1.000000e+00 : f32
    %474 = vector.broadcast %cst_178 : f32 to vector<2x32xf32>
    %475 = arith.addf %474, %473 : vector<2x32xf32>
    %476 = arith.divf %474, %475 : vector<2x32xf32>
    %477 = arith.mulf %468, %444 : vector<2x32xf32>
    %478 = arith.mulf %462, %470 : vector<2x32xf32>
    %479 = arith.addf %477, %478 : vector<2x32xf32>
    %480 = math.tanh %479 : vector<2x32xf32>
    %481 = arith.mulf %476, %480 : vector<2x32xf32>
    %c2_i32_179 = arith.constant 2 : i32
    %482 = arith.muli %c4_i32_169, %c2_i32_179 : i32
    %483 = arith.index_cast %482 : i32 to index
    %c0_180 = arith.constant 0 : index
    %484 = vector.load %arg8[%483, %c0_180] : memref<16x32xf32, #tpu.memory_space<vmem>>, vector<2x32xf32>
    tpu.vector_store %arg8[%483, %c0_180], %481 {strides = array<i32>} : memref<16x32xf32, #tpu.memory_space<vmem>>, vector<2x32xf32>,
    %c5_i32_181 = arith.constant 5 : i32
    %c2_i32_182 = arith.constant 2 : i32
    %485 = arith.muli %c5_i32_181, %c2_i32_182 : i32
    %486 = arith.index_cast %485 : i32 to index
    %c0_183 = arith.constant 0 : index
    %487 = vector.load %arg9[%486, %c0_183] : memref<16x128xf32, #tpu.memory_space<vmem>>, vector<2x128xf32>
    %c1_184 = arith.constant 1 : index
    %c0_185 = arith.constant 0 : index
    %c0_186 = arith.constant 0 : index
    %488 = vector.load %arg5[%c1_184, %c0_185, %c0_186] : memref<2x32x128xf32, #tpu.memory_space<vmem>>, vector<1x32x128xf32>
    %489 = vector.shape_cast %488 : vector<1x32x128xf32> to vector<32x128xf32>
    %cst_187 = arith.constant dense<0.000000e+00> : vector<2x128xf32>
    %490 = tpu.matmul %481, %489, %cst_187 {dimension_numbers = #tpu.dot_dimension_numbers<[1], [0], [0], [1], [0, 0, 1, 1], [], []>} : vector<2x32xf32>, vector<32x128xf32>, vector<2x128xf32> -> vector<2x128xf32>
    %491 = arith.addf %487, %490 : vector<2x128xf32>
    %492 = vector.extract_strided_slice %491 {offsets = [0, 0], sizes = [2, 32], strides = [1, 1]} : vector<2x128xf32> to vector<2x32xf32>
    %493 = arith.negf %492 : vector<2x32xf32>
    %494 = math.exp %493 : vector<2x32xf32>
    %cst_188 = arith.constant 1.000000e+00 : f32
    %495 = vector.broadcast %cst_188 : f32 to vector<2x32xf32>
    %496 = arith.addf %495, %494 : vector<2x32xf32>
    %497 = arith.divf %495, %496 : vector<2x32xf32>
    %498 = vector.extract_strided_slice %491 {offsets = [0, 32], sizes = [2, 32], strides = [1, 1]} : vector<2x128xf32> to vector<2x32xf32>
    %499 = arith.negf %498 : vector<2x32xf32>
    %500 = math.exp %499 : vector<2x32xf32>
    %cst_189 = arith.constant 1.000000e+00 : f32
    %501 = vector.broadcast %cst_189 : f32 to vector<2x32xf32>
    %502 = arith.addf %501, %500 : vector<2x32xf32>
    %503 = arith.divf %501, %502 : vector<2x32xf32>
    %504 = vector.extract_strided_slice %491 {offsets = [0, 64], sizes = [2, 32], strides = [1, 1]} : vector<2x128xf32> to vector<2x32xf32>
    %505 = math.tanh %504 : vector<2x32xf32>
    %506 = vector.extract_strided_slice %491 {offsets = [0, 96], sizes = [2, 32], strides = [1, 1]} : vector<2x128xf32> to vector<2x32xf32>
    %507 = arith.negf %506 : vector<2x32xf32>
    %508 = math.exp %507 : vector<2x32xf32>
    %cst_190 = arith.constant 1.000000e+00 : f32
    %509 = vector.broadcast %cst_190 : f32 to vector<2x32xf32>
    %510 = arith.addf %509, %508 : vector<2x32xf32>
    %511 = arith.divf %509, %510 : vector<2x32xf32>
    %512 = arith.mulf %503, %479 : vector<2x32xf32>
    %513 = arith.mulf %497, %505 : vector<2x32xf32>
    %514 = arith.addf %512, %513 : vector<2x32xf32>
    %515 = math.tanh %514 : vector<2x32xf32>
    %516 = arith.mulf %511, %515 : vector<2x32xf32>
    %c2_i32_191 = arith.constant 2 : i32
    %517 = arith.muli %c5_i32_181, %c2_i32_191 : i32
    %518 = arith.index_cast %517 : i32 to index
    %c0_192 = arith.constant 0 : index
    %519 = vector.load %arg8[%518, %c0_192] : memref<16x32xf32, #tpu.memory_space<vmem>>, vector<2x32xf32>
    tpu.vector_store %arg8[%518, %c0_192], %516 {strides = array<i32>} : memref<16x32xf32, #tpu.memory_space<vmem>>, vector<2x32xf32>,
    %c6_i32_193 = arith.constant 6 : i32
    %c2_i32_194 = arith.constant 2 : i32
    %520 = arith.muli %c6_i32_193, %c2_i32_194 : i32
    %521 = arith.index_cast %520 : i32 to index
    %c0_195 = arith.constant 0 : index
    %522 = vector.load %arg9[%521, %c0_195] : memref<16x128xf32, #tpu.memory_space<vmem>>, vector<2x128xf32>
    %c1_196 = arith.constant 1 : index
    %c0_197 = arith.constant 0 : index
    %c0_198 = arith.constant 0 : index
    %523 = vector.load %arg5[%c1_196, %c0_197, %c0_198] : memref<2x32x128xf32, #tpu.memory_space<vmem>>, vector<1x32x128xf32>
    %524 = vector.shape_cast %523 : vector<1x32x128xf32> to vector<32x128xf32>
    %cst_199 = arith.constant dense<0.000000e+00> : vector<2x128xf32>
    %525 = tpu.matmul %516, %524, %cst_199 {dimension_numbers = #tpu.dot_dimension_numbers<[1], [0], [0], [1], [0, 0, 1, 1], [], []>} : vector<2x32xf32>, vector<32x128xf32>, vector<2x128xf32> -> vector<2x128xf32>
    %526 = arith.addf %522, %525 : vector<2x128xf32>
    %527 = vector.extract_strided_slice %526 {offsets = [0, 0], sizes = [2, 32], strides = [1, 1]} : vector<2x128xf32> to vector<2x32xf32>
    %528 = arith.negf %527 : vector<2x32xf32>
    %529 = math.exp %528 : vector<2x32xf32>
    %cst_200 = arith.constant 1.000000e+00 : f32
    %530 = vector.broadcast %cst_200 : f32 to vector<2x32xf32>
    %531 = arith.addf %530, %529 : vector<2x32xf32>
    %532 = arith.divf %530, %531 : vector<2x32xf32>
    %533 = vector.extract_strided_slice %526 {offsets = [0, 32], sizes = [2, 32], strides = [1, 1]} : vector<2x128xf32> to vector<2x32xf32>
    %534 = arith.negf %533 : vector<2x32xf32>
    %535 = math.exp %534 : vector<2x32xf32>
    %cst_201 = arith.constant 1.000000e+00 : f32
    %536 = vector.broadcast %cst_201 : f32 to vector<2x32xf32>
    %537 = arith.addf %536, %535 : vector<2x32xf32>
    %538 = arith.divf %536, %537 : vector<2x32xf32>
    %539 = vector.extract_strided_slice %526 {offsets = [0, 64], sizes = [2, 32], strides = [1, 1]} : vector<2x128xf32> to vector<2x32xf32>
    %540 = math.tanh %539 : vector<2x32xf32>
    %541 = vector.extract_strided_slice %526 {offsets = [0, 96], sizes = [2, 32], strides = [1, 1]} : vector<2x128xf32> to vector<2x32xf32>
    %542 = arith.negf %541 : vector<2x32xf32>
    %543 = math.exp %542 : vector<2x32xf32>
    %cst_202 = arith.constant 1.000000e+00 : f32
    %544 = vector.broadcast %cst_202 : f32 to vector<2x32xf32>
    %545 = arith.addf %544, %543 : vector<2x32xf32>
    %546 = arith.divf %544, %545 : vector<2x32xf32>
    %547 = arith.mulf %538, %514 : vector<2x32xf32>
    %548 = arith.mulf %532, %540 : vector<2x32xf32>
    %549 = arith.addf %547, %548 : vector<2x32xf32>
    %550 = math.tanh %549 : vector<2x32xf32>
    %551 = arith.mulf %546, %550 : vector<2x32xf32>
    %c2_i32_203 = arith.constant 2 : i32
    %552 = arith.muli %c6_i32_193, %c2_i32_203 : i32
    %553 = arith.index_cast %552 : i32 to index
    %c0_204 = arith.constant 0 : index
    %554 = vector.load %arg8[%553, %c0_204] : memref<16x32xf32, #tpu.memory_space<vmem>>, vector<2x32xf32>
    tpu.vector_store %arg8[%553, %c0_204], %551 {strides = array<i32>} : memref<16x32xf32, #tpu.memory_space<vmem>>, vector<2x32xf32>,
    %c7_i32_205 = arith.constant 7 : i32
    %c2_i32_206 = arith.constant 2 : i32
    %555 = arith.muli %c7_i32_205, %c2_i32_206 : i32
    %556 = arith.index_cast %555 : i32 to index
    %c0_207 = arith.constant 0 : index
    %557 = vector.load %arg9[%556, %c0_207] : memref<16x128xf32, #tpu.memory_space<vmem>>, vector<2x128xf32>
    %c1_208 = arith.constant 1 : index
    %c0_209 = arith.constant 0 : index
    %c0_210 = arith.constant 0 : index
    %558 = vector.load %arg5[%c1_208, %c0_209, %c0_210] : memref<2x32x128xf32, #tpu.memory_space<vmem>>, vector<1x32x128xf32>
    %559 = vector.shape_cast %558 : vector<1x32x128xf32> to vector<32x128xf32>
    %cst_211 = arith.constant dense<0.000000e+00> : vector<2x128xf32>
    %560 = tpu.matmul %551, %559, %cst_211 {dimension_numbers = #tpu.dot_dimension_numbers<[1], [0], [0], [1], [0, 0, 1, 1], [], []>} : vector<2x32xf32>, vector<32x128xf32>, vector<2x128xf32> -> vector<2x128xf32>
    %561 = arith.addf %557, %560 : vector<2x128xf32>
    %562 = vector.extract_strided_slice %561 {offsets = [0, 0], sizes = [2, 32], strides = [1, 1]} : vector<2x128xf32> to vector<2x32xf32>
    %563 = arith.negf %562 : vector<2x32xf32>
    %564 = math.exp %563 : vector<2x32xf32>
    %cst_212 = arith.constant 1.000000e+00 : f32
    %565 = vector.broadcast %cst_212 : f32 to vector<2x32xf32>
    %566 = arith.addf %565, %564 : vector<2x32xf32>
    %567 = arith.divf %565, %566 : vector<2x32xf32>
    %568 = vector.extract_strided_slice %561 {offsets = [0, 32], sizes = [2, 32], strides = [1, 1]} : vector<2x128xf32> to vector<2x32xf32>
    %569 = arith.negf %568 : vector<2x32xf32>
    %570 = math.exp %569 : vector<2x32xf32>
    %cst_213 = arith.constant 1.000000e+00 : f32
    %571 = vector.broadcast %cst_213 : f32 to vector<2x32xf32>
    %572 = arith.addf %571, %570 : vector<2x32xf32>
    %573 = arith.divf %571, %572 : vector<2x32xf32>
    %574 = vector.extract_strided_slice %561 {offsets = [0, 64], sizes = [2, 32], strides = [1, 1]} : vector<2x128xf32> to vector<2x32xf32>
    %575 = math.tanh %574 : vector<2x32xf32>
    %576 = vector.extract_strided_slice %561 {offsets = [0, 96], sizes = [2, 32], strides = [1, 1]} : vector<2x128xf32> to vector<2x32xf32>
    %577 = arith.negf %576 : vector<2x32xf32>
    %578 = math.exp %577 : vector<2x32xf32>
    %cst_214 = arith.constant 1.000000e+00 : f32
    %579 = vector.broadcast %cst_214 : f32 to vector<2x32xf32>
    %580 = arith.addf %579, %578 : vector<2x32xf32>
    %581 = arith.divf %579, %580 : vector<2x32xf32>
    %582 = arith.mulf %573, %549 : vector<2x32xf32>
    %583 = arith.mulf %567, %575 : vector<2x32xf32>
    %584 = arith.addf %582, %583 : vector<2x32xf32>
    %585 = math.tanh %584 : vector<2x32xf32>
    %586 = arith.mulf %581, %585 : vector<2x32xf32>
    %c2_i32_215 = arith.constant 2 : i32
    %587 = arith.muli %c7_i32_205, %c2_i32_215 : i32
    %588 = arith.index_cast %587 : i32 to index
    %c0_216 = arith.constant 0 : index
    %589 = vector.load %arg8[%588, %c0_216] : memref<16x32xf32, #tpu.memory_space<vmem>>, vector<2x32xf32>
    tpu.vector_store %arg8[%588, %c0_216], %586 {strides = array<i32>} : memref<16x32xf32, #tpu.memory_space<vmem>>, vector<2x32xf32>,
    %c8_i32_217 = arith.constant 8 : i32
    %c0_218 = arith.constant 0 : index
    %c0_219 = arith.constant 0 : index
    %590 = vector.load %arg8[%c0_218, %c0_219] : memref<16x32xf32, #tpu.memory_space<vmem>>, vector<16x32xf32>
    %c0_220 = arith.constant 0 : index
    %c0_221 = arith.constant 0 : index
    %c0_222 = arith.constant 0 : index
    %591 = vector.load %arg7[%c0_220, %c0_221, %c0_222] : memref<1x16x32xf32, #tpu.memory_space<vmem>>, vector<1x16x32xf32>
    %592 = vector.shape_cast %591 : vector<1x16x32xf32> to vector<16x32xf32>
    %593 = vector.shape_cast %590 : vector<16x32xf32> to vector<1x16x32xf32>
    tpu.vector_store %arg7[%c0_220, %c0_221, %c0_222], %593 {strides = array<i32>} : memref<1x16x32xf32, #tpu.memory_space<vmem>>, vector<1x16x32xf32>,
    return
  }
  func.func @transform_0(%arg0: i32) -> (i32, i32, i32) {
    %c0_i32 = arith.constant 0 : i32
    %c0_i32_0 = arith.constant 0 : i32
    %c0_i32_1 = arith.constant 0 : i32
    return %arg0, %c0_i32, %c0_i32_0 : i32, i32, i32
  }
  func.func @transform_1(%arg0: i32) -> (i32, i32) {
    %c0_i32 = arith.constant 0 : i32
    %c0_i32_0 = arith.constant 0 : i32
    %c0_i32_1 = arith.constant 0 : i32
    return %c0_i32, %c0_i32_0 : i32, i32
  }
  func.func @transform_2(%arg0: i32) -> (i32, i32) {
    %c0_i32 = arith.constant 0 : i32
    %c0_i32_0 = arith.constant 0 : i32
    %c0_i32_1 = arith.constant 0 : i32
    return %c0_i32, %c0_i32_0 : i32, i32
  }
  func.func @transform_3(%arg0: i32) -> (i32, i32, i32) {
    %c0_i32 = arith.constant 0 : i32
    %c0_i32_0 = arith.constant 0 : i32
    %c0_i32_1 = arith.constant 0 : i32
    %c0_i32_2 = arith.constant 0 : i32
    return %c0_i32, %c0_i32_0, %c0_i32_1 : i32, i32, i32
  }
  func.func @transform_4(%arg0: i32) -> (i32, i32, i32) {
    %c0_i32 = arith.constant 0 : i32
    %c0_i32_0 = arith.constant 0 : i32
    %c0_i32_1 = arith.constant 0 : i32
    %c0_i32_2 = arith.constant 0 : i32
    return %c0_i32, %c0_i32_0, %c0_i32_1 : i32, i32, i32
  }
  func.func @transform_5(%arg0: i32) -> (i32, i32, i32) {
    %c0_i32 = arith.constant 0 : i32
    %c0_i32_0 = arith.constant 0 : i32
    %c0_i32_1 = arith.constant 0 : i32
    %c0_i32_2 = arith.constant 0 : i32
    return %c0_i32, %c0_i32_0, %c0_i32_1 : i32, i32, i32
  }
  func.func @transform_6(%arg0: i32) -> (i32, i32, i32) {
    %c0_i32 = arith.constant 0 : i32
    %c0_i32_0 = arith.constant 0 : i32
    %c0_i32_1 = arith.constant 0 : i32
    return %arg0, %c0_i32, %c0_i32_0 : i32, i32, i32
  }
}

</mosaic_0001>

<bundles_post_ra>
// kernel: tpu_custom_call.1
= control target key start
LH: loop header
LB: loop body
LE: loop exit
PB: predicated region body
PF: predicated region fallthrough
CT: control target
= control target key end

     0   :  { %11 = vsyncpa [#allocation5], 0  ;;  %s3073_s0 = inlined_call_operand.hbm [shape: f32[1,16,25], index: 0, kind: input, shape index: {}]   ;;  %s3074_s1 = inlined_call_operand.hbm [shape: f32[25,32], index: 1, kind: input, shape index: {}]   ;;  %s3075_s2 = inlined_call_operand.vmem [shape: f32[1,32], index: 2, kind: input, shape index: {}]   ;;  %s3076_s3 = inlined_call_operand.hbm [shape: f32[2,32,128], index: 3, kind: input, shape index: {}]   ;;  %s3077_s4 = inlined_call_operand.hbm [shape: f32[2,32,128], index: 4, kind: input, shape index: {}]   ;;  %s3078_s5 = inlined_call_operand.vmem [shape: f32[2,1,128], index: 5, kind: input, shape index: {}]   ;;  %s3079_s6 = inlined_call_operand.hbm [shape: f32[1,16,32], index: 6, kind: output, shape index: {}]  }
   0x1   :  { %12 = vsyncpa [#allocation8], 0 }
   0x2   :  { %13 = vsyncpa [#allocation11], 0 }
   0x3   :  { %14 = vsyncpa [#allocation6], 0  ;;  %s2706_s21 = smov [#allocation7]   ;;  %s2707_s23 = smov [#allocation4]  }
   0x4   :  { %s32_s22 = sshll.u32 %s2706_s21, 4  ;;  %s20_s24 = sshll.u32 %s2707_s23, 4  ;;  %s33_s22 = int_to_ptr.vmem [resolvable:$true] %s32_s22  ;;  %s21_s24 = int_to_ptr.vmem [resolvable:$true] %s20_s24 }
   0x5   :  { %s2606_s25 = scalar_lea.vmem %s33_s22, 512  ;;  %p2611_p1 = scmp.lt.s32.totalorder %s33_s22, %s33_s22 }
   0x6   :  { %p2607_p0 = scmp.ne.s32.totalorder %s33_s22, %s2606_s25  ;;  %p2612_p2 = scmp.lt.s32.totalorder %s2606_s25, %s2606_s25 }
   0x8   :  { %p2613_p3 = por %p2612_p2, %p2611_p1 }
   0xa   :  { %p2614_p4 = pnand %p2613_p3, %p2607_p0 }
   0xc   :  { %2617 = shalt.err (!%p2614_p4)
}
   0xd   :  { %s2708_s26 = smov 128   ;;  %s2709_s27 = smov 8  }
   0xe   :  { %38 = dma.hbm_to_vmem [thread:$0]  %s3074_s1, 512, %s33_s22, [#allocation8], %s2708_s26, %s2708_s26, %s2709_s27  }
   0xf   :  { %s2626_s30 = scalar_lea.vmem %s21_s24, 256  ;;  %p2631_p6 = scmp.lt.s32.totalorder %s21_s24, %s21_s24 }
  0x10   :  { %p2627_p5 = scmp.ne.s32.totalorder %s21_s24, %s2626_s30  ;;  %p2632_p7 = scmp.lt.s32.totalorder %s2626_s30, %s2626_s30 }
  0x12   :  { %p2633_p8 = por %p2632_p7, %p2631_p6 }
  0x14   :  { %p2634_p9 = pnand %p2633_p8, %p2627_p5 }
  0x16   :  { %2637 = shalt.err (!%p2634_p9)
}
  0x17   :  { %26 = dma.hbm_to_vmem [thread:$0]  %s3073_s0, 256, %s21_s24, [#allocation5], %s2708_s26, %s2708_s26, %s2709_s27  }
  0x18   :  { %s2710_s9 = smov [#allocation9]   ;;  %s2711_s11 = smov [#allocation10]  }
  0x19   :  { %s46_s10 = sshll.u32 %s2710_s9, 4  ;;  %s58_s12 = sshll.u32 %s2711_s11, 4  ;;  %s47_s10 = int_to_ptr.vmem [resolvable:$true] %s46_s10  ;;  %s59_s12 = int_to_ptr.vmem [resolvable:$true] %s58_s12 }
  0x1a   :  { %s2646_s1 = scalar_lea.vmem %s47_s10, 1024  ;;  %p2651_p11 = scmp.lt.s32.totalorder %s47_s10, %s47_s10 }
  0x1b   :  { %p2647_p10 = scmp.ne.s32.totalorder %s47_s10, %s2646_s1  ;;  %p2652_p12 = scmp.lt.s32.totalorder %s2646_s1, %s2646_s1 }
  0x1d   :  { %p2653_p13 = por %p2652_p12, %p2651_p11 }
  0x1f   :  { %p2654_p0 = pnand %p2653_p13, %p2647_p10 }
  0x21   :  { %2657 = shalt.err (!%p2654_p0)
}
  0x22   :  { %52 = dma.hbm_to_vmem [thread:$0]  %s3076_s3, 1024, %s47_s10, [#allocation8], %s2708_s26, %s2708_s26, %s2709_s27  }
  0x23   :  { %s2666_s0 = scalar_lea.vmem %s59_s12, 1024  ;;  %p2671_p2 = scmp.lt.s32.totalorder %s59_s12, %s59_s12 }
  0x24   :  { %p2667_p1 = scmp.ne.s32.totalorder %s59_s12, %s2666_s0  ;;  %p2672_p3 = scmp.lt.s32.totalorder %s2666_s0, %s2666_s0 }
  0x26   :  { %p2673_p4 = por %p2672_p3, %p2671_p2 }
  0x28   :  { %p2674_p5 = pnand %p2673_p4, %p2667_p1 }
  0x2a   :  { %2677 = shalt.err (!%p2674_p5)
}
  0x2b   :  { %64 = dma.hbm_to_vmem [thread:$0]  %s3077_s4, 1024, %s59_s12, [#allocation11], %s2708_s26, %s2708_s26, %s2709_s27  }
  0x2c   :  { %2698 = dma.done.wait [#allocation5], 256  }
  0x2d   :  { %2699 = vsyncadd [#allocation5], 4294967040 }
  0x2e   :  { %2700 = dma.done.wait [#allocation8], 1536  }
  0x2f   :  { %2701 = vsyncadd [#allocation8], 4294965760 }
  0x30   :  { %2702 = dma.done.wait [#allocation11], 1024  }
  0x31   :  { %2703 = vsyncadd [#allocation11], 4294966272  ;;  %vm99_vm0 = vcmask 1040384   ;;  %vm92_vm1 = vcmask 203776   ;;  %v84_v0 = vld [vmem:[#allocation7 + $0x18] sm:$0x1] }
  0x32   :  { %v83_v1 = vld [vmem:[#allocation7 + $0x10] sm:$0xff]  ;;  %2250 = vmatprep.subr.msk.mxu0 %vm99_vm0, %v84_v0  ;;  %v82_v3 = vld [vmem:[#allocation7 + $0x8] sm:$0xff]  ;;  %v81_v4 = vld [vmem:[#allocation7] sm:$0xff]  ;;  %v2712_v11 = vmov 0.0   ;;  %vm2713_vm2 = vmmov 0   ;;  %vm178_vm3 = vcmask 261120  }
  0x33   :  { %v79_v2 = vld [vmem:[#allocation4] sm:$0xff]  ;;  %2251 = vmatpush3.msk.msra.mxu0 %vm99_vm0, %v84_v0  ;;  %v80_v5 = vld [vmem:[#allocation4 + $0x8] sm:$0xff]  ;;  %v184_v8 = vld [vmem:[#allocation9 + $0x8] sm:$0xff]  ;;  %s2714_s18 = smov 64   ;;  %s2715_s19 = smov 32   ;;  %vm384_vm4 = vcmask 254976  }
  0x34   :  { %2258 = vmatprep.mubr.msk.f32.mxu0 %vm92_vm1, %v79_v2  ;;  %2252 = vmatprep.subr.mxu0 %v83_v1  ;;  %v186_v6 = vld [vmem:[#allocation9 + $0x18] sm:$0xff]  ;;  %v185_v7 = vld [vmem:[#allocation9 + $0x10] sm:$0xff]  ;;  %v183_v9 = vld [vmem:[#allocation9] sm:$0xff] }
  0x35   :  { %2253 = vmatpush3.msra.mxu0 %v83_v1  ;;  %2261 = vmatprep.subr.mxu1 %v186_v6  ;;  %v2778_v10 = vld [vmem:[#allocation10 + $0x18] sm:$0xff]  ;;  %v2781_v12 = vld [vmem:[#allocation10 + $0x10] sm:$0xff]  ;;  %v2788_v13 = vld [vmem:[#allocation10 + $0x8] sm:$0xff] }
  0x36   :  { %2254 = vmatprep.subr.mxu0 %v82_v3  ;;  %2262 = vmatpush3.msra.mxu1 %v186_v6  ;;  %v2792_v14 = vld [vmem:[#allocation10] sm:$0xff]  ;;  %v2111_v15 = vld [vmem:[%s3075_s2] ss:$0 sm:$0xff] }
  0x37   :  { %2255 = vmatpush3.msra.mxu0 %v82_v3  ;;  %2263 = vmatprep.subr.mxu1 %v185_v7  ;;  %v2115_v24 = vld [vmem:[%s3078_s5] ss:$0 sm:$0xff] }
  0x38   :  { %2256 = vmatprep.subr.mxu0 %v81_v4  ;;  %2264 = vmatpush3.msra.mxu1 %v185_v7 }
  0x39   :  { %2257 = vmatpush3.msra.mxu0 %v81_v4  ;;  %2265 = vmatprep.subr.mxu1 %v184_v8 }
  0x3a   :  { %2259 = vmatmul.mubr.msk.f32.vlgmr.msra.gmra.mxu0 %vm92_vm1, %v80_v5  ;;  %2266 = vmatpush3.msra.mxu1 %v184_v8 }
  0x3b   :  { %2267 = vmatprep.subr.mxu1 %v183_v9  ;;  %2272 = vmatprep.subr.mxu0 %v2712_v11 }
  0x3c   :  { %2268 = vmatpush3.msra.mxu1 %v183_v9  ;;  %2280 = vmatprep.mubr.msk.f32.mxu0 %vm2713_vm2, %v2712_v11 }
  0x3d   :  { %2273 = vmatpush3.msra.mxu0 %v2778_v10  ;;  %2283 = vmatprep.subr.mxu1 %v2712_v11 }
  0x3e   :  { %2274 = vmatprep.subr.mxu0 %v2712_v11 }
  0x3f   :  { %2275 = vmatpush3.msra.mxu0 %v2781_v12 }
  0x40   :  { %2276 = vmatprep.subr.mxu0 %v2712_v11 }
  0x41   :  { %2277 = vmatpush3.msra.mxu0 %v2788_v13 }
  0x42   :  { %2278 = vmatprep.subr.mxu0 %v2712_v11 }
  0x43   :  { %2279 = vmatpush3.msra.mxu0 %v2792_v14 }
  0x44   :  { %2281 = vmatmul.mubr.f32.vlgmr.msra.gmra.mxu0 %v2712_v11  ;;  %2294 = vmatprep.subr.mxu0 %v2712_v11 }
  0x45   :  { %2295 = vmatpush3.msra.mxu0 %v2778_v10  ;;  %2302 = vmatprep.mubr.msk.f32.mxu0 %vm2713_vm2, %v2712_v11 }
  0x46   :  { %2296 = vmatprep.subr.mxu0 %v2712_v11 }
  0x47   :  { %2297 = vmatpush3.msra.mxu0 %v2781_v12 }
  0x48   :  { %2298 = vmatprep.subr.mxu0 %v2712_v11 }
  0x49   :  { %2299 = vmatpush3.msra.mxu0 %v2788_v13 }
  0x4a   :  { %2300 = vmatprep.subr.mxu0 %v2712_v11 }
  0x4b   :  { %2301 = vmatpush3.msra.mxu0 %v2792_v14 }
  0x4c   :  { %2316 = vmatprep.subr.mxu0 %v2712_v11 }
  0xfa   :  { %v2260_v16 = vpop.f32.mrf.mxu0 }
  0xfb   :  { %v175_v17 = vadd.f32 %v2260_v16, %v2111_v15 }
  0xfc   :  { %v169_v18 = vpop.f32.mrf.mxu0 }
  0xfd   :  { %180 = vst.msk [vmem:[#allocation2 + $0x8] sm:$0xff] %vm178_vm3, %v175_v17  ;;  %v170_v19 = vadd.f32 %v2111_v15, %v169_v18 }
  0xff   :  { %179 = vst.msk [vmem:[#allocation2] sm:$0xff] %vm178_vm3, %v170_v19 }
 0x104   :  { %v182_v21 = vld [vmem:[#allocation2 + $0x8] sm:$0xff]  ;;  %v351_v22 = vpop.f32.mrf.mxu0 }
 0x106   :  { %v181_v20 = vld [vmem:[#allocation2] sm:$0xff]  ;;  %v2282_v23 = vpop.f32.mrf.mxu0 }
 0x107   :  { %2269 = vmatprep.mubr.msk.f32.mxu1 %vm178_vm3, %v181_v20 }
 0x108   :  { %2270 = vmatmul.mubr.msk.f32.vlgmr.msra.gmra.mxu1 %vm178_vm3, %v182_v21 }
 0x109   :  { %2284 = vmatpush3.msra.mxu1 %v2778_v10  ;;  %2291 = vmatprep.mubr.msk.f32.mxu1 %vm2713_vm2, %v2712_v11 }
 0x10a   :  { %2285 = vmatprep.subr.mxu1 %v2712_v11 }
 0x10b   :  { %2286 = vmatpush3.msra.mxu1 %v2781_v12 }
 0x10c   :  { %2287 = vmatprep.subr.mxu1 %v2712_v11 }
 0x10d   :  { %2288 = vmatpush3.msra.mxu1 %v2788_v13 }
 0x10e   :  { %2289 = vmatprep.subr.mxu1 %v2712_v11 }
 0x10f   :  { %2290 = vmatpush3.msra.mxu1 %v2792_v14 }
 0x110   :  { %2305 = vmatprep.subr.mxu1 %v2712_v11 }
 0x1c8   :  { %v2271_v25 = vpop.f32.mrf.mxu1 }
 0x1c9   :  { %v272_v26 = vadd.f32 %v2271_v25, %v2115_v24 }
 0x1ca   :  { %v266_v27 = vpop.f32.mrf.mxu1 }
 0x1cb   :  { %276 = vst [vmem:[#allocation3 + $0x8] sm:$0xff] %v272_v26  ;;  %v267_v28 = vadd.f32 %v2115_v24, %v266_v27 }
 0x1cd   :  { %275 = vst [vmem:[#allocation3] sm:$0xff] %v267_v28 }
 0x1d4   :  { %v277_v29 = vld [vmem:[#allocation3] sm:$0x3]  ;;  %v386_v45 = vld [vmem:[#allocation3 + $0x2] sm:$0x3]  ;;  %v493_v63 = vld [vmem:[#allocation3 + $0x4] sm:$0x3] }
 0x1d5   :  { %v355_v30 = vadd.f32 %v351_v22, %v277_v29  ;;  %v600_v22 = vld [vmem:[#allocation3 + $0x6] sm:$0x3] }
 0x1d7   :  { %2470 = vtanh.f32 %v355_v30  ;;  %v2118_v32 = vmul.f32 -1.442695, %v355_v30 }
 0x1d9   :  { %2472 = vpow2.f32 %v2118_v32 }
 0x1e4   :  { %v2471_v31 = vpop.eup %2470 }
 0x1e5   :  { %365 = vrot.lane.b32.xlu0 %v2471_v31, %s2714_s18 }
 0x1e6   :  { %v2473_v33 = vpop.eup %2472 }
 0x1e7   :  { %v359_v34 = vadd.f32 1.0, %v2473_v33 }
 0x1e9   :  { %2474 = vrcp.f32 %v359_v34 }
 0x1f6   :  { %v2475_v35 = vpop.eup %2474 }
 0x1f7   :  { %v363_v38 = vmul.f32 0.0, %v2475_v35 }
 0x257   :  { %v366_v36 = vpop.permute.xlu0 %365 }
 0x258   :  { %v368_v37 = vmul.f32 %v2475_v35, %v366_v36 }
 0x25a   :  { %370 = vrot.lane.b32.xlu0 %v368_v37, %s2715_s19 }
 0x2cc   :  { %v371_v39 = vpop.permute.xlu0 %370 }
 0x2cd   :  { %v373_v40 = vadd.f32 %v371_v39, %v363_v38 }
 0x2cf   :  { %2476 = vtanh.f32 %v373_v40 }
 0x2dc   :  { %v2477_v41 = vpop.eup %2476 }
 0x2dd   :  { %376 = vrot.lane.b32.xlu1 %v2477_v41, %s2714_s18 }
 0x34f   :  { %v377_v42 = vpop.permute.xlu1 %376 }
 0x350   :  { %v379_v43 = vmul.f32 %v2475_v35, %v377_v42 }
 0x352   :  { %381 = vrot.lane.b32.xlu1 %v379_v43, %s2715_s19 }
 0x3c4   :  { %v382_v44 = vpop.permute.xlu1 %381 }
 0x3c5   :  { %385 = vst.msk [vmem:[#allocation2] sm:$0x3] %vm384_vm4, %v382_v44  ;;  %2292 = vmatmul.mubr.msk.f32.vlgmr.msra.gmra.mxu1 %vm178_vm3, %v382_v44 }
 0x3c6   :  { %2306 = vmatpush3.msra.mxu1 %v2778_v10  ;;  %2313 = vmatprep.mubr.msk.f32.mxu1 %vm2713_vm2, %v2712_v11 }
 0x3c7   :  { %2307 = vmatprep.subr.mxu1 %v2712_v11 }
 0x3c8   :  { %2308 = vmatpush3.msra.mxu1 %v2781_v12 }
 0x3c9   :  { %2309 = vmatprep.subr.mxu1 %v2712_v11 }
 0x3ca   :  { %2310 = vmatpush3.msra.mxu1 %v2788_v13 }
 0x3cb   :  { %2311 = vmatprep.subr.mxu1 %v2712_v11 }
 0x3cc   :  { %2312 = vmatpush3.msra.mxu1 %v2792_v14 }
 0x3cd   :  { %2327 = vmatprep.subr.mxu1 %v2712_v11 }
 0x485   :  { %v459_v46 = vpop.f32.mrf.mxu1 }
 0x486   :  { %v463_v47 = vadd.f32 %v459_v46, %v386_v45 }
 0x487   :  { %v2293_v48 = vpop.f32.mrf.mxu1 }
 0x488   :  { %2478 = vtanh.f32 %v463_v47  ;;  %v2120_v50 = vmul.f32 -1.442695, %v463_v47 }
 0x48a   :  { %2480 = vpow2.f32 %v2120_v50 }
 0x495   :  { %v2479_v49 = vpop.eup %2478 }
 0x496   :  { %473 = vrot.lane.b32.xlu0 %v2479_v49, %s2714_s18 }
 0x497   :  { %v2481_v51 = vpop.eup %2480 }
 0x498   :  { %v467_v52 = vadd.f32 1.0, %v2481_v51 }
 0x49a   :  { %2482 = vrcp.f32 %v467_v52 }
 0x4a7   :  { %v2483_v53 = vpop.eup %2482 }
 0x4a8   :  { %v471_v56 = vmul.f32 %v2483_v53, %v373_v40  ;;  %v707_v40 = vld [vmem:[#allocation3 + $0x8] sm:$0x3] }
 0x508   :  { %v474_v54 = vpop.permute.xlu0 %473 }
 0x509   :  { %v476_v55 = vmul.f32 %v2483_v53, %v474_v54 }
 0x50b   :  { %478 = vrot.lane.b32.xlu1 %v476_v55, %s2715_s19 }
 0x57d   :  { %v479_v57 = vpop.permute.xlu1 %478 }
 0x57e   :  { %v481_v58 = vadd.f32 %v479_v57, %v471_v56 }
 0x580   :  { %2484 = vtanh.f32 %v481_v58 }
 0x58d   :  { %v2485_v59 = vpop.eup %2484 }
 0x58e   :  { %484 = vrot.lane.b32.xlu0 %v2485_v59, %s2714_s18 }
 0x600   :  { %v485_v60 = vpop.permute.xlu0 %484 }
 0x601   :  { %v487_v61 = vmul.f32 %v2483_v53, %v485_v60 }
 0x603   :  { %489 = vrot.lane.b32.xlu1 %v487_v61, %s2715_s19 }
 0x675   :  { %v490_v62 = vpop.permute.xlu1 %489 }
 0x676   :  { %492 = vst.msk [vmem:[#allocation2 + $0x2] sm:$0x3] %vm384_vm4, %v490_v62  ;;  %2303 = vmatmul.mubr.msk.f32.vlgmr.msra.gmra.mxu0 %vm178_vm3, %v490_v62 }
 0x677   :  { %2317 = vmatpush3.msra.mxu0 %v2778_v10  ;;  %2324 = vmatprep.mubr.msk.f32.mxu0 %vm2713_vm2, %v2712_v11 }
 0x678   :  { %2318 = vmatprep.subr.mxu0 %v2712_v11 }
 0x679   :  { %2319 = vmatpush3.msra.mxu0 %v2781_v12 }
 0x67a   :  { %2320 = vmatprep.subr.mxu0 %v2712_v11 }
 0x67b   :  { %2321 = vmatpush3.msra.mxu0 %v2788_v13 }
 0x67c   :  { %2322 = vmatprep.subr.mxu0 %v2712_v11 }
 0x67d   :  { %2323 = vmatpush3.msra.mxu0 %v2792_v14 }
 0x67e   :  { %2338 = vmatprep.subr.mxu0 %v2712_v11 }
 0x736   :  { %v566_v0 = vpop.f32.mrf.mxu0 }
 0x737   :  { %v570_v1 = vadd.f32 %v566_v0, %v493_v63 }
 0x738   :  { %v2304_v2 = vpop.f32.mrf.mxu0 }
 0x739   :  { %2486 = vtanh.f32 %v570_v1  ;;  %v2122_v4 = vmul.f32 -1.442695, %v570_v1 }
 0x73b   :  { %2488 = vpow2.f32 %v2122_v4 }
 0x746   :  { %v2487_v3 = vpop.eup %2486 }
 0x747   :  { %580 = vrot.lane.b32.xlu0 %v2487_v3, %s2714_s18 }
 0x748   :  { %v2489_v5 = vpop.eup %2488 }
 0x749   :  { %v574_v6 = vadd.f32 1.0, %v2489_v5 }
 0x74b   :  { %2490 = vrcp.f32 %v574_v6 }
 0x758   :  { %v2491_v7 = vpop.eup %2490 }
 0x759   :  { %v578_v15 = vmul.f32 %v2491_v7, %v481_v58  ;;  %v814_v58 = vld [vmem:[#allocation3 + $0xa] sm:$0x3] }
 0x7b9   :  { %v581_v8 = vpop.permute.xlu0 %580 }
 0x7ba   :  { %v583_v9 = vmul.f32 %v2491_v7, %v581_v8 }
 0x7bc   :  { %585 = vrot.lane.b32.xlu1 %v583_v9, %s2715_s19  ;;  %v921_v9 = vld [vmem:[#allocation3 + $0xc] sm:$0x3] }
 0x82e   :  { %v586_v16 = vpop.permute.xlu1 %585 }
 0x82f   :  { %v588_v17 = vadd.f32 %v586_v16, %v578_v15 }
 0x831   :  { %2492 = vtanh.f32 %v588_v17 }
 0x83e   :  { %v2493_v18 = vpop.eup %2492 }
 0x83f   :  { %591 = vrot.lane.b32.xlu0 %v2493_v18, %s2714_s18 }
 0x8b1   :  { %v592_v19 = vpop.permute.xlu0 %591 }
 0x8b2   :  { %v594_v20 = vmul.f32 %v2491_v7, %v592_v19 }
 0x8b4   :  { %596 = vrot.lane.b32.xlu1 %v594_v20, %s2715_s19 }
 0x926   :  { %v597_v21 = vpop.permute.xlu1 %596 }
 0x927   :  { %599 = vst.msk [vmem:[#allocation2 + $0x4] sm:$0x3] %vm384_vm4, %v597_v21  ;;  %2314 = vmatmul.mubr.msk.f32.vlgmr.msra.gmra.mxu1 %vm178_vm3, %v597_v21 }
 0x928   :  { %2328 = vmatpush3.msra.mxu1 %v2778_v10  ;;  %2335 = vmatprep.mubr.msk.f32.mxu1 %vm2713_vm2, %v2712_v11 }
 0x929   :  { %2329 = vmatprep.subr.mxu1 %v2712_v11 }
 0x92a   :  { %2330 = vmatpush3.msra.mxu1 %v2781_v12 }
 0x92b   :  { %2331 = vmatprep.subr.mxu1 %v2712_v11 }
 0x92c   :  { %2332 = vmatpush3.msra.mxu1 %v2788_v13 }
 0x92d   :  { %2333 = vmatprep.subr.mxu1 %v2712_v11 }
 0x92e   :  { %2334 = vmatpush3.msra.mxu1 %v2792_v14 }
 0x92f   :  { %2349 = vmatprep.subr.mxu1 %v2712_v11 }
 0x9e7   :  { %v673_v23 = vpop.f32.mrf.mxu1 }
 0x9e8   :  { %v677_v24 = vadd.f32 %v673_v23, %v600_v22 }
 0x9e9   :  { %v2315_v25 = vpop.f32.mrf.mxu1 }
 0x9ea   :  { %2494 = vtanh.f32 %v677_v24  ;;  %v2124_v27 = vmul.f32 -1.442695, %v677_v24 }
 0x9ec   :  { %2496 = vpow2.f32 %v2124_v27 }
 0x9f7   :  { %v2495_v26 = vpop.eup %2494 }
 0x9f8   :  { %687 = vrot.lane.b32.xlu0 %v2495_v26, %s2714_s18 }
 0x9f9   :  { %v2497_v28 = vpop.eup %2496 }
 0x9fa   :  { %v681_v29 = vadd.f32 1.0, %v2497_v28 }
 0x9fc   :  { %2498 = vrcp.f32 %v681_v29 }
 0xa09   :  { %v2499_v30 = vpop.eup %2498 }
 0xa0a   :  { %v685_v33 = vmul.f32 %v2499_v30, %v588_v17 }
 0xa6a   :  { %v688_v31 = vpop.permute.xlu0 %687 }
 0xa6b   :  { %v690_v32 = vmul.f32 %v2499_v30, %v688_v31 }
 0xa6d   :  { %692 = vrot.lane.b32.xlu1 %v690_v32, %s2715_s19  ;;  %v1028_v32 = vld [vmem:[#allocation3 + $0xe] sm:$0x3] }
 0xadf   :  { %v693_v34 = vpop.permute.xlu1 %692 }
 0xae0   :  { %v695_v35 = vadd.f32 %v693_v34, %v685_v33 }
 0xae2   :  { %2500 = vtanh.f32 %v695_v35 }
 0xaef   :  { %v2501_v36 = vpop.eup %2500 }
 0xaf0   :  { %698 = vrot.lane.b32.xlu0 %v2501_v36, %s2714_s18 }
 0xb62   :  { %v699_v37 = vpop.permute.xlu0 %698 }
 0xb63   :  { %v701_v38 = vmul.f32 %v2499_v30, %v699_v37 }
 0xb65   :  { %703 = vrot.lane.b32.xlu1 %v701_v38, %s2715_s19 }
 0xbd7   :  { %v704_v39 = vpop.permute.xlu1 %703 }
 0xbd8   :  { %706 = vst.msk [vmem:[#allocation2 + $0x6] sm:$0x3] %vm384_vm4, %v704_v39  ;;  %2325 = vmatmul.mubr.msk.f32.vlgmr.msra.gmra.mxu0 %vm178_vm3, %v704_v39 }
 0xbd9   :  { %2339 = vmatpush3.msra.mxu0 %v2778_v10  ;;  %2346 = vmatprep.mubr.msk.f32.mxu0 %vm2713_vm2, %v2712_v11 }
 0xbda   :  { %2340 = vmatprep.subr.mxu0 %v2712_v11 }
 0xbdb   :  { %2341 = vmatpush3.msra.mxu0 %v2781_v12 }
 0xbdc   :  { %2342 = vmatprep.subr.mxu0 %v2712_v11 }
 0xbdd   :  { %2343 = vmatpush3.msra.mxu0 %v2788_v13 }
 0xbde   :  { %2344 = vmatprep.subr.mxu0 %v2712_v11 }
 0xbdf   :  { %2345 = vmatpush3.msra.mxu0 %v2792_v14  ;;  %v1135_v8 = vld [vmem:[#allocation2] sm:$0xff] }
 0xc98   :  { %v780_v41 = vpop.f32.mrf.mxu0 }
 0xc99   :  { %v784_v42 = vadd.f32 %v780_v41, %v707_v40 }
 0xc9a   :  { %v2326_v43 = vpop.f32.mrf.mxu0 }
 0xc9b   :  { %2502 = vtanh.f32 %v784_v42  ;;  %v2126_v45 = vmul.f32 -1.442695, %v784_v42 }
 0xc9d   :  { %2504 = vpow2.f32 %v2126_v45 }
 0xca8   :  { %v2503_v44 = vpop.eup %2502 }
 0xca9   :  { %794 = vrot.lane.b32.xlu0 %v2503_v44, %s2714_s18 }
 0xcaa   :  { %v2505_v46 = vpop.eup %2504 }
 0xcab   :  { %v788_v47 = vadd.f32 1.0, %v2505_v46 }
 0xcad   :  { %2506 = vrcp.f32 %v788_v47  ;;  %v1141_v47 = vld [vmem:[#allocation9 + $0x38] sm:$0xff] }
 0xcae   :  { %2360 = vmatprep.subr.mxu0 %v1141_v47 }
 0xcba   :  { %v2507_v48 = vpop.eup %2506 }
 0xcbb   :  { %v792_v51 = vmul.f32 %v2507_v48, %v695_v35 }
 0xd1b   :  { %v795_v49 = vpop.permute.xlu0 %794 }
 0xd1c   :  { %v797_v50 = vmul.f32 %v2507_v48, %v795_v49  ;;  %v1139_v49 = vld [vmem:[#allocation9 + $0x28] sm:$0xff] }
 0xd1e   :  { %799 = vrot.lane.b32.xlu1 %v797_v50, %s2715_s19  ;;  %v1138_v50 = vld [vmem:[#allocation9 + $0x20] sm:$0xff] }
 0xd90   :  { %v800_v52 = vpop.permute.xlu1 %799 }
 0xd91   :  { %v802_v53 = vadd.f32 %v800_v52, %v792_v51  ;;  %v2926_v51 = vld [vmem:[#allocation10 + $0x38] sm:$0xff]  ;;  %v2928_v52 = vld [vmem:[#allocation10 + $0x30] sm:$0xff] }
 0xd93   :  { %2508 = vtanh.f32 %v802_v53 }
 0xda0   :  { %v2509_v54 = vpop.eup %2508 }
 0xda1   :  { %805 = vrot.lane.b32.xlu0 %v2509_v54, %s2714_s18  ;;  %v2933_v54 = vld [vmem:[#allocation10 + $0x28] sm:$0xff] }
 0xe13   :  { %v806_v55 = vpop.permute.xlu0 %805 }
 0xe14   :  { %v808_v56 = vmul.f32 %v2507_v48, %v806_v55  ;;  %v1140_v48 = vld [vmem:[#allocation9 + $0x30] sm:$0xff] }
 0xe16   :  { %810 = vrot.lane.b32.xlu1 %v808_v56, %s2715_s19  ;;  %v2937_v56 = vld [vmem:[#allocation10 + $0x20] sm:$0xff] }
 0xe88   :  { %v811_v57 = vpop.permute.xlu1 %810 }
 0xe89   :  { %813 = vst.msk [vmem:[#allocation2 + $0x8] sm:$0x3] %vm384_vm4, %v811_v57  ;;  %2336 = vmatmul.mubr.msk.f32.vlgmr.msra.gmra.mxu1 %vm178_vm3, %v811_v57 }
 0xe8a   :  { %2350 = vmatpush3.msra.mxu1 %v2778_v10  ;;  %2357 = vmatprep.mubr.msk.f32.mxu1 %vm2713_vm2, %v2712_v11 }
 0xe8b   :  { %2351 = vmatprep.subr.mxu1 %v2712_v11 }
 0xe8c   :  { %2352 = vmatpush3.msra.mxu1 %v2781_v12 }
 0xe8d   :  { %2353 = vmatprep.subr.mxu1 %v2712_v11 }
 0xe8e   :  { %2354 = vmatpush3.msra.mxu1 %v2788_v13 }
 0xe8f   :  { %2355 = vmatprep.subr.mxu1 %v2712_v11 }
 0xe90   :  { %2356 = vmatpush3.msra.mxu1 %v2792_v14 }
 0xe91   :  { %2371 = vmatprep.subr.mxu1 %v2712_v11 }
 0xf49   :  { %v887_v59 = vpop.f32.mrf.mxu1 }
 0xf4a   :  { %v891_v10 = vadd.f32 %v887_v59, %v814_v58 }
 0xf4b   :  { %v2337_v60 = vpop.f32.mrf.mxu1 }
 0xf4c   :  { %2510 = vtanh.f32 %v891_v10  ;;  %v2128_v62 = vmul.f32 -1.442695, %v891_v10  ;;  %v2134_v60 = vld [vmem:[%s3078_s5 + $0x1] ss:$0 sm:$0xff]  ;;  %s2716_s5 = smov [#allocation12]  }
 0xf4d   :  { %s2097_s22 = sshll.u32 %s2716_s5, 4  ;;  %s2098_s22 = int_to_ptr.vmem [resolvable:$true] %s2097_s22 }
 0xf4e   :  { %2512 = vpow2.f32 %v2128_v62  ;;  %s2678_s23 = scalar_lea.vmem %s2098_s22, 256  ;;  %p2683_p7 = scmp.lt.s32.totalorder %s2098_s22, %s2098_s22 }
 0xf4f   :  { %p2679_p6 = scmp.ne.s32.totalorder %s2098_s22, %s2678_s23  ;;  %p2684_p8 = scmp.lt.s32.totalorder %s2678_s23, %s2678_s23 }
 0xf51   :  { %p2685_p9 = por %p2684_p8, %p2683_p7 }
 0xf53   :  { %p2686_p10 = pnand %p2685_p9, %p2679_p6 }
 0xf59   :  { %v2511_v61 = vpop.eup %2510 }
 0xf5a   :  { %901 = vrot.lane.b32.xlu0 %v2511_v61, %s2714_s18 }
 0xf5b   :  { %v2513_v12 = vpop.eup %2512 }
 0xf5c   :  { %v895_v63 = vadd.f32 1.0, %v2513_v12 }
 0xf5e   :  { %2514 = vrcp.f32 %v895_v63 }
 0xf6b   :  { %v2515_v13 = vpop.eup %2514 }
 0xf6c   :  { %v899_v14 = vmul.f32 %v2515_v13, %v802_v53 }
 0xfcc   :  { %v902_v0 = vpop.permute.xlu0 %901 }
 0xfcd   :  { %v904_v1 = vmul.f32 %v2515_v13, %v902_v0 }
 0xfcf   :  { %906 = vrot.lane.b32.xlu1 %v904_v1, %s2715_s19 }
0x1041   :  { %v907_v2 = vpop.permute.xlu1 %906 }
0x1042   :  { %v909_v3 = vadd.f32 %v907_v2, %v899_v14 }
0x1044   :  { %2516 = vtanh.f32 %v909_v3 }
0x1051   :  { %v2517_v4 = vpop.eup %2516 }
0x1052   :  { %912 = vrot.lane.b32.xlu0 %v2517_v4, %s2714_s18 }
0x10c4   :  { %v913_v5 = vpop.permute.xlu0 %912 }
0x10c5   :  { %v915_v6 = vmul.f32 %v2515_v13, %v913_v5 }
0x10c7   :  { %917 = vrot.lane.b32.xlu1 %v915_v6, %s2715_s19 }
0x1139   :  { %v918_v7 = vpop.permute.xlu1 %917 }
0x113a   :  { %920 = vst.msk [vmem:[#allocation2 + $0xa] sm:$0x3] %vm384_vm4, %v918_v7  ;;  %2347 = vmatmul.mubr.msk.f32.vlgmr.msra.gmra.mxu0 %vm178_vm3, %v918_v7 }
0x113b   :  { %2368 = vmatprep.mubr.msk.f32.mxu0 %vm178_vm3, %v1135_v8  ;;  %2361 = vmatpush3.msra.mxu0 %v1141_v47 }
0x113c   :  { %2362 = vmatprep.subr.mxu0 %v1140_v48 }
0x113d   :  { %2363 = vmatpush3.msra.mxu0 %v1140_v48 }
0x113e   :  { %2364 = vmatprep.subr.mxu0 %v1139_v49 }
0x113f   :  { %2365 = vmatpush3.msra.mxu0 %v1139_v49 }
0x1140   :  { %2366 = vmatprep.subr.mxu0 %v1138_v50 }
0x1141   :  { %2367 = vmatpush3.msra.mxu0 %v1138_v50 }
0x1142   :  { %2382 = vmatprep.subr.mxu0 %v2712_v11 }
0x11fa   :  { %v994_v15 = vpop.f32.mrf.mxu0 }
0x11fb   :  { %v998_v16 = vadd.f32 %v994_v15, %v921_v9 }
0x11fc   :  { %v2348_v17 = vpop.f32.mrf.mxu0 }
0x11fd   :  { %2518 = vtanh.f32 %v998_v16  ;;  %v2130_v19 = vmul.f32 -1.442695, %v998_v16 }
0x11ff   :  { %2520 = vpow2.f32 %v2130_v19 }
0x120a   :  { %v2519_v18 = vpop.eup %2518 }
0x120b   :  { %1008 = vrot.lane.b32.xlu0 %v2519_v18, %s2714_s18 }
0x120c   :  { %v2521_v20 = vpop.eup %2520 }
0x120d   :  { %v1002_v21 = vadd.f32 1.0, %v2521_v20 }
0x120f   :  { %2522 = vrcp.f32 %v1002_v21 }
0x121c   :  { %v2523_v22 = vpop.eup %2522 }
0x121d   :  { %v1006_v25 = vmul.f32 %v2523_v22, %v909_v3 }
0x127d   :  { %v1009_v23 = vpop.permute.xlu0 %1008 }
0x127e   :  { %v1011_v24 = vmul.f32 %v2523_v22, %v1009_v23 }
0x1280   :  { %1013 = vrot.lane.b32.xlu1 %v1011_v24, %s2715_s19 }
0x12f2   :  { %v1014_v26 = vpop.permute.xlu1 %1013 }
0x12f3   :  { %v1016_v27 = vadd.f32 %v1014_v26, %v1006_v25 }
0x12f5   :  { %2524 = vtanh.f32 %v1016_v27 }
0x1302   :  { %v2525_v28 = vpop.eup %2524 }
0x1303   :  { %1019 = vrot.lane.b32.xlu0 %v2525_v28, %s2714_s18 }
0x1375   :  { %v1020_v29 = vpop.permute.xlu0 %1019 }
0x1376   :  { %v1022_v30 = vmul.f32 %v2523_v22, %v1020_v29 }
0x1378   :  { %1024 = vrot.lane.b32.xlu1 %v1022_v30, %s2715_s19 }
0x13ea   :  { %v1025_v31 = vpop.permute.xlu1 %1024 }
0x13eb   :  { %1027 = vst.msk [vmem:[#allocation2 + $0xc] sm:$0x3] %vm384_vm4, %v1025_v31  ;;  %2358 = vmatmul.mubr.msk.f32.vlgmr.msra.gmra.mxu1 %vm178_vm3, %v1025_v31 }
0x13ec   :  { %2379 = vmatprep.mubr.msk.f32.mxu1 %vm2713_vm2, %v2712_v11  ;;  %2372 = vmatpush3.msra.mxu1 %v2926_v51 }
0x13ed   :  { %2373 = vmatprep.subr.mxu1 %v2712_v11 }
0x13ee   :  { %2374 = vmatpush3.msra.mxu1 %v2928_v52 }
0x13ef   :  { %2375 = vmatprep.subr.mxu1 %v2712_v11 }
0x13f0   :  { %2376 = vmatpush3.msra.mxu1 %v2933_v54 }
0x13f1   :  { %2377 = vmatprep.subr.mxu1 %v2712_v11 }
0x13f2   :  { %2378 = vmatpush3.msra.mxu1 %v2937_v56 }
0x13f3   :  { %2380 = vmatmul.mubr.f32.vlgmr.msra.gmra.mxu1 %v2712_v11  ;;  %2393 = vmatprep.subr.mxu1 %v2712_v11 }
0x13f4   :  { %2394 = vmatpush3.msra.mxu1 %v2926_v51  ;;  %2401 = vmatprep.mubr.msk.f32.mxu1 %vm2713_vm2, %v2712_v11 }
0x13f5   :  { %2395 = vmatprep.subr.mxu1 %v2712_v11 }
0x13f6   :  { %2396 = vmatpush3.msra.mxu1 %v2928_v52 }
0x13f7   :  { %2397 = vmatprep.subr.mxu1 %v2712_v11 }
0x13f8   :  { %2398 = vmatpush3.msra.mxu1 %v2933_v54 }
0x13f9   :  { %2399 = vmatprep.subr.mxu1 %v2712_v11 }
0x13fa   :  { %2400 = vmatpush3.msra.mxu1 %v2937_v56 }
0x13fb   :  { %2415 = vmatprep.subr.mxu1 %v2712_v11 }
0x14ab   :  { %v1101_v33 = vpop.f32.mrf.mxu1 }
0x14ac   :  { %v1105_v34 = vadd.f32 %v1101_v33, %v1028_v32 }
0x14ad   :  { %v2359_v35 = vpop.f32.mrf.mxu1 }
0x14ae   :  { %2526 = vtanh.f32 %v1105_v34  ;;  %v2132_v37 = vmul.f32 -1.442695, %v1105_v34 }
0x14b0   :  { %2528 = vpow2.f32 %v2132_v37 }
0x14b3   :  { %v1305_v59 = vpop.f32.mrf.mxu1 }
0x14b5   :  { %v2381_v10 = vpop.f32.mrf.mxu1 }
0x14bb   :  { %v2527_v36 = vpop.eup %2526 }
0x14bc   :  { %1115 = vrot.lane.b32.xlu0 %v2527_v36, %s2714_s18 }
0x14bd   :  { %v2529_v38 = vpop.eup %2528 }
0x14be   :  { %v1109_v39 = vadd.f32 1.0, %v2529_v38 }
0x14c0   :  { %2530 = vrcp.f32 %v1109_v39 }
0x14cd   :  { %v2531_v40 = vpop.eup %2530 }
0x14ce   :  { %v1113_v43 = vmul.f32 %v2531_v40, %v1016_v27 }
0x152e   :  { %v1116_v41 = vpop.permute.xlu0 %1115 }
0x152f   :  { %v1118_v42 = vmul.f32 %v2531_v40, %v1116_v41 }
0x1531   :  { %1120 = vrot.lane.b32.xlu1 %v1118_v42, %s2715_s19 }
0x15a3   :  { %v1121_v44 = vpop.permute.xlu1 %1120 }
0x15a4   :  { %v1123_v45 = vadd.f32 %v1121_v44, %v1113_v43 }
0x15a6   :  { %2532 = vtanh.f32 %v1123_v45 }
0x15b3   :  { %v2533_v46 = vpop.eup %2532 }
0x15b4   :  { %1126 = vrot.lane.b32.xlu0 %v2533_v46, %s2714_s18 }
0x1626   :  { %v1127_v53 = vpop.permute.xlu0 %1126 }
0x1627   :  { %v1129_v55 = vmul.f32 %v2531_v40, %v1127_v53 }
0x1629   :  { %1131 = vrot.lane.b32.xlu1 %v1129_v55, %s2715_s19 }
0x169b   :  { %v1132_v57 = vpop.permute.xlu1 %1131 }
0x169c   :  { %1134 = vst.msk [vmem:[#allocation2 + $0xe] sm:$0x3] %vm384_vm4, %v1132_v57 }
0x16a3   :  { %v1136_v58 = vld [vmem:[#allocation2 + $0x8] sm:$0xff] }
0x16a4   :  { %2369 = vmatmul.mubr.msk.f32.vlgmr.msra.gmra.mxu0 %vm178_vm3, %v1136_v58 }
0x16a5   :  { %2383 = vmatpush3.msra.mxu0 %v2926_v51  ;;  %2390 = vmatprep.mubr.msk.f32.mxu0 %vm2713_vm2, %v2712_v11 }
0x16a6   :  { %2384 = vmatprep.subr.mxu0 %v2712_v11 }
0x16a7   :  { %2385 = vmatpush3.msra.mxu0 %v2928_v52 }
0x16a8   :  { %2386 = vmatprep.subr.mxu0 %v2712_v11 }
0x16a9   :  { %2387 = vmatpush3.msra.mxu0 %v2933_v54 }
0x16aa   :  { %2388 = vmatprep.subr.mxu0 %v2712_v11 }
0x16ab   :  { %2389 = vmatpush3.msra.mxu0 %v2937_v56 }
0x16ac   :  { %2404 = vmatprep.subr.mxu0 %v2712_v11 }
0x1764   :  { %v2370_v61 = vpop.f32.mrf.mxu0 }
0x1765   :  { %v1228_v62 = vadd.f32 %v2370_v61, %v2134_v60 }
0x1766   :  { %v1222_v12 = vpop.f32.mrf.mxu0 }
0x1767   :  { %1232 = vst [vmem:[#allocation3 + $0x8] sm:$0xff] %v1228_v62  ;;  %v1223_v63 = vadd.f32 %v2134_v60, %v1222_v12 }
0x1769   :  { %1231 = vst [vmem:[#allocation3] sm:$0xff] %v1223_v63 }
0x1770   :  { %v1233_v13 = vld [vmem:[#allocation3] sm:$0x3]  ;;  %v1339_v19 = vld [vmem:[#allocation3 + $0x2] sm:$0x3]  ;;  %v1446_v37 = vld [vmem:[#allocation3 + $0x4] sm:$0x3] }
0x1771   :  { %v1309_v0 = vadd.f32 %v1305_v59, %v1233_v13  ;;  %v1553_v59 = vld [vmem:[#allocation3 + $0x6] sm:$0x3] }
0x1773   :  { %2534 = vtanh.f32 %v1309_v0  ;;  %v2137_v14 = vmul.f32 -1.442695, %v1309_v0 }
0x1775   :  { %2536 = vpow2.f32 %v2137_v14 }
0x1780   :  { %v2535_v1 = vpop.eup %2534 }
0x1781   :  { %1319 = vrot.lane.b32.xlu0 %v2535_v1, %s2714_s18 }
0x1782   :  { %v2537_v2 = vpop.eup %2536 }
0x1783   :  { %v1313_v3 = vadd.f32 1.0, %v2537_v2 }
0x1785   :  { %2538 = vrcp.f32 %v1313_v3 }
0x1792   :  { %v2539_v4 = vpop.eup %2538 }
0x1793   :  { %v1317_v7 = vmul.f32 0.0, %v2539_v4 }
0x17f3   :  { %v1320_v5 = vpop.permute.xlu0 %1319 }
0x17f4   :  { %v1322_v6 = vmul.f32 %v2539_v4, %v1320_v5 }
0x17f6   :  { %1324 = vrot.lane.b32.xlu1 %v1322_v6, %s2715_s19 }
0x1868   :  { %v1325_v8 = vpop.permute.xlu1 %1324 }
0x1869   :  { %v1327_v9 = vadd.f32 %v1325_v8, %v1317_v7 }
0x186b   :  { %2540 = vtanh.f32 %v1327_v9 }
0x1878   :  { %v2541_v15 = vpop.eup %2540 }
0x1879   :  { %1330 = vrot.lane.b32.xlu0 %v2541_v15, %s2714_s18  ;;  %v1660_v15 = vld [vmem:[#allocation3 + $0x8] sm:$0x3] }
0x18eb   :  { %v1331_v16 = vpop.permute.xlu0 %1330 }
0x18ec   :  { %v1333_v17 = vmul.f32 %v2539_v4, %v1331_v16 }
0x18ee   :  { %1335 = vrot.lane.b32.xlu1 %v1333_v17, %s2715_s19 }
0x1960   :  { %v1336_v18 = vpop.permute.xlu1 %1335 }
0x1961   :  { %1338 = vst.msk [vmem:[#allocation2] sm:$0x3] %vm384_vm4, %v1336_v18  ;;  %2391 = vmatmul.mubr.msk.f32.vlgmr.msra.gmra.mxu0 %vm178_vm3, %v1336_v18 }
0x1962   :  { %2405 = vmatpush3.msra.mxu0 %v2926_v51  ;;  %2412 = vmatprep.mubr.msk.f32.mxu0 %vm2713_vm2, %v2712_v11 }
0x1963   :  { %2406 = vmatprep.subr.mxu0 %v2712_v11 }
0x1964   :  { %2407 = vmatpush3.msra.mxu0 %v2928_v52 }
0x1965   :  { %2408 = vmatprep.subr.mxu0 %v2712_v11 }
0x1966   :  { %2409 = vmatpush3.msra.mxu0 %v2933_v54 }
0x1967   :  { %2410 = vmatprep.subr.mxu0 %v2712_v11 }
0x1968   :  { %2411 = vmatpush3.msra.mxu0 %v2937_v56 }
0x1969   :  { %2426 = vmatprep.subr.mxu0 %v2712_v11 }
0x1a21   :  { %v1412_v20 = vpop.f32.mrf.mxu0 }
0x1a22   :  { %v1416_v21 = vadd.f32 %v1412_v20, %v1339_v19 }
0x1a23   :  { %v2392_v22 = vpop.f32.mrf.mxu0 }
0x1a24   :  { %2542 = vtanh.f32 %v1416_v21  ;;  %v2139_v24 = vmul.f32 -1.442695, %v1416_v21 }
0x1a26   :  { %2544 = vpow2.f32 %v2139_v24 }
0x1a31   :  { %v2543_v23 = vpop.eup %2542 }
0x1a32   :  { %1426 = vrot.lane.b32.xlu0 %v2543_v23, %s2714_s18 }
0x1a33   :  { %v2545_v25 = vpop.eup %2544 }
0x1a34   :  { %v1420_v26 = vadd.f32 1.0, %v2545_v25 }
0x1a36   :  { %2546 = vrcp.f32 %v1420_v26 }
0x1a43   :  { %v2547_v27 = vpop.eup %2546 }
0x1a44   :  { %v1424_v30 = vmul.f32 %v2547_v27, %v1327_v9 }
0x1aa4   :  { %v1427_v28 = vpop.permute.xlu0 %1426 }
0x1aa5   :  { %v1429_v29 = vmul.f32 %v2547_v27, %v1427_v28 }
0x1aa7   :  { %1431 = vrot.lane.b32.xlu1 %v1429_v29, %s2715_s19 }
0x1b19   :  { %v1432_v31 = vpop.permute.xlu1 %1431 }
0x1b1a   :  { %v1434_v32 = vadd.f32 %v1432_v31, %v1424_v30 }
0x1b1c   :  { %2548 = vtanh.f32 %v1434_v32 }
0x1b29   :  { %v2549_v33 = vpop.eup %2548 }
0x1b2a   :  { %1437 = vrot.lane.b32.xlu0 %v2549_v33, %s2714_s18  ;;  %v1767_v33 = vld [vmem:[#allocation3 + $0xa] sm:$0x3] }
0x1b9c   :  { %v1438_v34 = vpop.permute.xlu0 %1437 }
0x1b9d   :  { %v1440_v35 = vmul.f32 %v2547_v27, %v1438_v34 }
0x1b9f   :  { %1442 = vrot.lane.b32.xlu1 %v1440_v35, %s2715_s19 }
0x1c11   :  { %v1443_v36 = vpop.permute.xlu1 %1442 }
0x1c12   :  { %1445 = vst.msk [vmem:[#allocation2 + $0x2] sm:$0x3] %vm384_vm4, %v1443_v36  ;;  %2402 = vmatmul.mubr.msk.f32.vlgmr.msra.gmra.mxu1 %vm178_vm3, %v1443_v36 }
0x1c13   :  { %2416 = vmatpush3.msra.mxu1 %v2926_v51  ;;  %2423 = vmatprep.mubr.msk.f32.mxu1 %vm2713_vm2, %v2712_v11 }
0x1c14   :  { %2417 = vmatprep.subr.mxu1 %v2712_v11 }
0x1c15   :  { %2418 = vmatpush3.msra.mxu1 %v2928_v52 }
0x1c16   :  { %2419 = vmatprep.subr.mxu1 %v2712_v11 }
0x1c17   :  { %2420 = vmatpush3.msra.mxu1 %v2933_v54 }
0x1c18   :  { %2421 = vmatprep.subr.mxu1 %v2712_v11 }
0x1c19   :  { %2422 = vmatpush3.msra.mxu1 %v2937_v56 }
0x1c1a   :  { %2437 = vmatprep.subr.mxu1 %v2712_v11 }
0x1cd2   :  { %v1519_v38 = vpop.f32.mrf.mxu1 }
0x1cd3   :  { %v1523_v39 = vadd.f32 %v1519_v38, %v1446_v37 }
0x1cd4   :  { %v2403_v40 = vpop.f32.mrf.mxu1 }
0x1cd5   :  { %2550 = vtanh.f32 %v1523_v39  ;;  %v2141_v42 = vmul.f32 -1.442695, %v1523_v39 }
0x1cd7   :  { %2552 = vpow2.f32 %v2141_v42 }
0x1ce2   :  { %v2551_v41 = vpop.eup %2550 }
0x1ce3   :  { %1533 = vrot.lane.b32.xlu0 %v2551_v41, %s2714_s18 }
0x1ce4   :  { %v2553_v43 = vpop.eup %2552 }
0x1ce5   :  { %v1527_v44 = vadd.f32 1.0, %v2553_v43 }
0x1ce7   :  { %2554 = vrcp.f32 %v1527_v44 }
0x1cf4   :  { %v2555_v45 = vpop.eup %2554 }
0x1cf5   :  { %v1531_v48 = vmul.f32 %v2555_v45, %v1434_v32 }
0x1d55   :  { %v1534_v46 = vpop.permute.xlu0 %1533 }
0x1d56   :  { %v1536_v47 = vmul.f32 %v2555_v45, %v1534_v46  ;;  %v1874_v46 = vld [vmem:[#allocation3 + $0xc] sm:$0x3] }
0x1d58   :  { %1538 = vrot.lane.b32.xlu1 %v1536_v47, %s2715_s19 }
0x1dca   :  { %v1539_v49 = vpop.permute.xlu1 %1538 }
0x1dcb   :  { %v1541_v50 = vadd.f32 %v1539_v49, %v1531_v48 }
0x1dcd   :  { %2556 = vtanh.f32 %v1541_v50 }
0x1dda   :  { %v2557_v53 = vpop.eup %2556 }
0x1ddb   :  { %1544 = vrot.lane.b32.xlu0 %v2557_v53, %s2714_s18 }
0x1e4d   :  { %v1545_v55 = vpop.permute.xlu0 %1544 }
0x1e4e   :  { %v1547_v57 = vmul.f32 %v2555_v45, %v1545_v55 }
0x1e50   :  { %1549 = vrot.lane.b32.xlu1 %v1547_v57, %s2715_s19 }
0x1ec2   :  { %v1550_v58 = vpop.permute.xlu1 %1549 }
0x1ec3   :  { %1552 = vst.msk [vmem:[#allocation2 + $0x4] sm:$0x3] %vm384_vm4, %v1550_v58  ;;  %2413 = vmatmul.mubr.msk.f32.vlgmr.msra.gmra.mxu0 %vm178_vm3, %v1550_v58 }
0x1ec4   :  { %2427 = vmatpush3.msra.mxu0 %v2926_v51  ;;  %2434 = vmatprep.mubr.msk.f32.mxu0 %vm2713_vm2, %v2712_v11 }
0x1ec5   :  { %2428 = vmatprep.subr.mxu0 %v2712_v11 }
0x1ec6   :  { %2429 = vmatpush3.msra.mxu0 %v2928_v52 }
0x1ec7   :  { %2430 = vmatprep.subr.mxu0 %v2712_v11 }
0x1ec8   :  { %2431 = vmatpush3.msra.mxu0 %v2933_v54 }
0x1ec9   :  { %2432 = vmatprep.subr.mxu0 %v2712_v11 }
0x1eca   :  { %2433 = vmatpush3.msra.mxu0 %v2937_v56 }
0x1ecb   :  { %2448 = vmatprep.subr.mxu0 %v2712_v11 }
0x1f83   :  { %v1626_v10 = vpop.f32.mrf.mxu0 }
0x1f84   :  { %v1630_v60 = vadd.f32 %v1626_v10, %v1553_v59 }
0x1f85   :  { %v2414_v61 = vpop.f32.mrf.mxu0 }
0x1f86   :  { %2558 = vtanh.f32 %v1630_v60  ;;  %v2143_v12 = vmul.f32 -1.442695, %v1630_v60 }
0x1f88   :  { %2560 = vpow2.f32 %v2143_v12 }
0x1f93   :  { %v2559_v62 = vpop.eup %2558 }
0x1f94   :  { %1640 = vrot.lane.b32.xlu0 %v2559_v62, %s2714_s18 }
0x1f95   :  { %v2561_v63 = vpop.eup %2560 }
0x1f96   :  { %v1634_v13 = vadd.f32 1.0, %v2561_v63 }
0x1f98   :  { %2562 = vrcp.f32 %v1634_v13 }
0x1fa5   :  { %v2563_v0 = vpop.eup %2562 }
0x1fa6   :  { %v1638_v2 = vmul.f32 %v2563_v0, %v1541_v50 }
0x2006   :  { %v1641_v1 = vpop.permute.xlu0 %1640 }
0x2007   :  { %v1643_v14 = vmul.f32 %v2563_v0, %v1641_v1  ;;  %v1981_v1 = vld [vmem:[#allocation3 + $0xe] sm:$0x3] }
0x2009   :  { %1645 = vrot.lane.b32.xlu1 %v1643_v14, %s2715_s19 }
0x207b   :  { %v1646_v3 = vpop.permute.xlu1 %1645 }
0x207c   :  { %v1648_v4 = vadd.f32 %v1646_v3, %v1638_v2 }
0x207e   :  { %2564 = vtanh.f32 %v1648_v4 }
0x208b   :  { %v2565_v5 = vpop.eup %2564 }
0x208c   :  { %1651 = vrot.lane.b32.xlu0 %v2565_v5, %s2714_s18 }
0x20fe   :  { %v1652_v6 = vpop.permute.xlu0 %1651 }
0x20ff   :  { %v1654_v7 = vmul.f32 %v2563_v0, %v1652_v6 }
0x2101   :  { %1656 = vrot.lane.b32.xlu1 %v1654_v7, %s2715_s19 }
0x2173   :  { %v1657_v8 = vpop.permute.xlu1 %1656 }
0x2174   :  { %1659 = vst.msk [vmem:[#allocation2 + $0x6] sm:$0x3] %vm384_vm4, %v1657_v8  ;;  %2424 = vmatmul.mubr.msk.f32.vlgmr.msra.gmra.mxu1 %vm178_vm3, %v1657_v8 }
0x2175   :  { %2438 = vmatpush3.msra.mxu1 %v2926_v51  ;;  %2445 = vmatprep.mubr.msk.f32.mxu1 %vm2713_vm2, %v2712_v11 }
0x2176   :  { %2439 = vmatprep.subr.mxu1 %v2712_v11 }
0x2177   :  { %2440 = vmatpush3.msra.mxu1 %v2928_v52 }
0x2178   :  { %2441 = vmatprep.subr.mxu1 %v2712_v11 }
0x2179   :  { %2442 = vmatpush3.msra.mxu1 %v2933_v54 }
0x217a   :  { %2443 = vmatprep.subr.mxu1 %v2712_v11 }
0x217b   :  { %2444 = vmatpush3.msra.mxu1 %v2937_v56  ;;  %v2088_v9 = vld [vmem:[#allocation2] sm:$0xff] }
0x217c   :  { %2090 = vst.msk [vmem:[#allocation12] sm:$0xff] %vm178_vm3, %v2088_v9 }
0x2234   :  { %v1733_v16 = vpop.f32.mrf.mxu1 }
0x2235   :  { %v1737_v17 = vadd.f32 %v1733_v16, %v1660_v15 }
0x2236   :  { %v2425_v18 = vpop.f32.mrf.mxu1 }
0x2237   :  { %2566 = vtanh.f32 %v1737_v17  ;;  %v2145_v20 = vmul.f32 -1.442695, %v1737_v17 }
0x2239   :  { %2568 = vpow2.f32 %v2145_v20 }
0x2244   :  { %v2567_v19 = vpop.eup %2566 }
0x2245   :  { %1747 = vrot.lane.b32.xlu0 %v2567_v19, %s2714_s18 }
0x2246   :  { %v2569_v21 = vpop.eup %2568 }
0x2247   :  { %v1741_v22 = vadd.f32 1.0, %v2569_v21 }
0x2249   :  { %2570 = vrcp.f32 %v1741_v22 }
0x2256   :  { %v2571_v23 = vpop.eup %2570 }
0x2257   :  { %v1745_v26 = vmul.f32 %v2571_v23, %v1648_v4 }
0x22b7   :  { %v1748_v24 = vpop.permute.xlu0 %1747 }
0x22b8   :  { %v1750_v25 = vmul.f32 %v2571_v23, %v1748_v24 }
0x22ba   :  { %1752 = vrot.lane.b32.xlu1 %v1750_v25, %s2715_s19 }
0x232c   :  { %v1753_v27 = vpop.permute.xlu1 %1752 }
0x232d   :  { %v1755_v28 = vadd.f32 %v1753_v27, %v1745_v26 }
0x232f   :  { %2572 = vtanh.f32 %v1755_v28 }
0x233c   :  { %v2573_v29 = vpop.eup %2572 }
0x233d   :  { %1758 = vrot.lane.b32.xlu0 %v2573_v29, %s2714_s18 }
0x23af   :  { %v1759_v30 = vpop.permute.xlu0 %1758 }
0x23b0   :  { %v1761_v31 = vmul.f32 %v2571_v23, %v1759_v30 }
0x23b2   :  { %1763 = vrot.lane.b32.xlu1 %v1761_v31, %s2715_s19 }
0x2424   :  { %v1764_v32 = vpop.permute.xlu1 %1763 }
0x2425   :  { %1766 = vst.msk [vmem:[#allocation2 + $0x8] sm:$0x3] %vm384_vm4, %v1764_v32  ;;  %2435 = vmatmul.mubr.msk.f32.vlgmr.msra.gmra.mxu0 %vm178_vm3, %v1764_v32 }
0x2426   :  { %2449 = vmatpush3.msra.mxu0 %v2926_v51  ;;  %2456 = vmatprep.mubr.msk.f32.mxu0 %vm2713_vm2, %v2712_v11 }
0x2427   :  { %2450 = vmatprep.subr.mxu0 %v2712_v11 }
0x2428   :  { %2451 = vmatpush3.msra.mxu0 %v2928_v52 }
0x2429   :  { %2452 = vmatprep.subr.mxu0 %v2712_v11 }
0x242a   :  { %2453 = vmatpush3.msra.mxu0 %v2933_v54 }
0x242b   :  { %2454 = vmatprep.subr.mxu0 %v2712_v11 }
0x242c   :  { %2455 = vmatpush3.msra.mxu0 %v2937_v56 }
0x24e5   :  { %v1840_v34 = vpop.f32.mrf.mxu0 }
0x24e6   :  { %v1844_v35 = vadd.f32 %v1840_v34, %v1767_v33 }
0x24e7   :  { %v2436_v36 = vpop.f32.mrf.mxu0 }
0x24e8   :  { %2574 = vtanh.f32 %v1844_v35  ;;  %v2147_v37 = vmul.f32 -1.442695, %v1844_v35 }
0x24ea   :  { %2576 = vpow2.f32 %v2147_v37 }
0x24f5   :  { %v2575_v51 = vpop.eup %2574 }
0x24f6   :  { %1854 = vrot.lane.b32.xlu0 %v2575_v51, %s2714_s18 }
0x24f7   :  { %v2577_v38 = vpop.eup %2576 }
0x24f8   :  { %v1848_v52 = vadd.f32 1.0, %v2577_v38 }
0x24fa   :  { %2578 = vrcp.f32 %v1848_v52 }
0x2507   :  { %v2579_v39 = vpop.eup %2578 }
0x2508   :  { %v1852_v11 = vmul.f32 %v2579_v39, %v1755_v28 }
0x2568   :  { %v1855_v40 = vpop.permute.xlu0 %1854 }
0x2569   :  { %v1857_v54 = vmul.f32 %v2579_v39, %v1855_v40 }
0x256b   :  { %1859 = vrot.lane.b32.xlu1 %v1857_v54, %s2715_s19 }
0x25dd   :  { %v1860_v56 = vpop.permute.xlu1 %1859 }
0x25de   :  { %v1862_v41 = vadd.f32 %v1860_v56, %v1852_v11 }
0x25e0   :  { %2580 = vtanh.f32 %v1862_v41 }
0x25ed   :  { %v2581_v42 = vpop.eup %2580 }
0x25ee   :  { %1865 = vrot.lane.b32.xlu0 %v2581_v42, %s2714_s18 }
0x2660   :  { %v1866_v43 = vpop.permute.xlu0 %1865 }
0x2661   :  { %v1868_v44 = vmul.f32 %v2579_v39, %v1866_v43 }
0x2663   :  { %1870 = vrot.lane.b32.xlu1 %v1868_v44, %s2715_s19 }
0x26d5   :  { %v1871_v45 = vpop.permute.xlu1 %1870 }
0x26d6   :  { %1873 = vst.msk [vmem:[#allocation2 + $0xa] sm:$0x3] %vm384_vm4, %v1871_v45  ;;  %2446 = vmatmul.mubr.msk.f32.vlgmr.msra.gmra.mxu1 %vm178_vm3, %v1871_v45 }
0x2796   :  { %v1947_v47 = vpop.f32.mrf.mxu1 }
0x2797   :  { %v1951_v48 = vadd.f32 %v1947_v47, %v1874_v46 }
0x2798   :  { %v2447_v49 = vpop.f32.mrf.mxu1 }
0x2799   :  { %2582 = vtanh.f32 %v1951_v48  ;;  %v2149_v53 = vmul.f32 -1.442695, %v1951_v48 }
0x279b   :  { %2584 = vpow2.f32 %v2149_v53 }
0x27a6   :  { %v2583_v50 = vpop.eup %2582 }
0x27a7   :  { %1961 = vrot.lane.b32.xlu0 %v2583_v50, %s2714_s18 }
0x27a8   :  { %v2585_v55 = vpop.eup %2584 }
0x27a9   :  { %v1955_v57 = vadd.f32 1.0, %v2585_v55 }
0x27ab   :  { %2586 = vrcp.f32 %v1955_v57 }
0x27b8   :  { %v2587_v58 = vpop.eup %2586 }
0x27b9   :  { %v1959_v60 = vmul.f32 %v2587_v58, %v1862_v41 }
0x2819   :  { %v1962_v59 = vpop.permute.xlu0 %1961 }
0x281a   :  { %v1964_v10 = vmul.f32 %v2587_v58, %v1962_v59 }
0x281c   :  { %1966 = vrot.lane.b32.xlu1 %v1964_v10, %s2715_s19 }
0x288e   :  { %v1967_v61 = vpop.permute.xlu1 %1966 }
0x288f   :  { %v1969_v62 = vadd.f32 %v1967_v61, %v1959_v60 }
0x2891   :  { %2588 = vtanh.f32 %v1969_v62 }
0x289e   :  { %v2589_v12 = vpop.eup %2588 }
0x289f   :  { %1972 = vrot.lane.b32.xlu0 %v2589_v12, %s2714_s18 }
0x2911   :  { %v1973_v63 = vpop.permute.xlu0 %1972 }
0x2912   :  { %v1975_v13 = vmul.f32 %v2587_v58, %v1973_v63 }
0x2914   :  { %1977 = vrot.lane.b32.xlu1 %v1975_v13, %s2715_s19 }
0x2986   :  { %v1978_v0 = vpop.permute.xlu1 %1977 }
0x2987   :  { %1980 = vst.msk [vmem:[#allocation2 + $0xc] sm:$0x3] %vm384_vm4, %v1978_v0  ;;  %2457 = vmatmul.mubr.msk.f32.vlgmr.msra.gmra.mxu0 %vm178_vm3, %v1978_v0 }
0x2a47   :  { %v2054_v14 = vpop.f32.mrf.mxu0 }
0x2a48   :  { %v2058_v2 = vadd.f32 %v2054_v14, %v1981_v1 }
0x2a49   :  { %v2458_v3 = vpop.f32.mrf.mxu0 }
0x2a4a   :  { %2590 = vtanh.f32 %v2058_v2  ;;  %v2151_v5 = vmul.f32 -1.442695, %v2058_v2 }
0x2a4c   :  { %2592 = vpow2.f32 %v2151_v5 }
0x2a57   :  { %v2591_v4 = vpop.eup %2590 }
0x2a58   :  { %2068 = vrot.lane.b32.xlu0 %v2591_v4, %s2714_s18 }
0x2a59   :  { %v2593_v6 = vpop.eup %2592 }
0x2a5a   :  { %v2062_v7 = vadd.f32 1.0, %v2593_v6 }
0x2a5c   :  { %2594 = vrcp.f32 %v2062_v7 }
0x2a69   :  { %v2595_v8 = vpop.eup %2594 }
0x2a6a   :  { %v2066_v16 = vmul.f32 %v2595_v8, %v1969_v62 }
0x2aca   :  { %v2069_v9 = vpop.permute.xlu0 %2068 }
0x2acb   :  { %v2071_v15 = vmul.f32 %v2595_v8, %v2069_v9 }
0x2acd   :  { %2073 = vrot.lane.b32.xlu1 %v2071_v15, %s2715_s19 }
0x2b3f   :  { %v2074_v17 = vpop.permute.xlu1 %2073 }
0x2b40   :  { %v2076_v18 = vadd.f32 %v2074_v17, %v2066_v16 }
0x2b42   :  { %2596 = vtanh.f32 %v2076_v18 }
0x2b4f   :  { %v2597_v19 = vpop.eup %2596 }
0x2b50   :  { %2079 = vrot.lane.b32.xlu0 %v2597_v19, %s2714_s18 }
0x2bc2   :  { %v2080_v20 = vpop.permute.xlu0 %2079 }
0x2bc3   :  { %v2082_v21 = vmul.f32 %v2595_v8, %v2080_v20 }
0x2bc5   :  { %2084 = vrot.lane.b32.xlu1 %v2082_v21, %s2715_s19 }
0x2c37   :  { %v2085_v22 = vpop.permute.xlu1 %2084 }
0x2c38   :  { %2087 = vst.msk [vmem:[#allocation2 + $0xe] sm:$0x3] %vm384_vm4, %v2085_v22 }
0x2c3f   :  { %v2089_v23 = vld [vmem:[#allocation2 + $0x8] sm:$0xff] }
0x2c40   :  { %2091 = vst.msk [vmem:[#allocation12 + $0x8] sm:$0xff] %vm178_vm3, %v2089_v23 }
0x2c41   :  { %2689 = shalt.err (!%p2686_p10)
}
0x2c42   :  { %2103 = dma.vmem_to_hbm [thread:$0]  %s2098_s22, 256, %s3079_s6, [#allocation6], %s2708_s26, %s2708_s26, %s2709_s27  }
0x2c43   :  { %2704 = dma.done.wait [#allocation6], 256  }
0x2c44   :  { %2705 = vsyncadd [#allocation6], 4294967040 }
0x2c45   :  { %2107 = vsyncpa [#allocation5], 1 }
0x2c46   :  { %2108 = vsyncpa [#allocation8], 1 }
0x2c47   :  { %2109 = vsyncpa [#allocation11], 1 }
0x2c48   :  { %2110 = vsyncpa [#allocation6], 1 }

</bundles_post_ra>
